<compile_context>
chip_gen: v7x
topology: tpu7x:2x2x1
jax: 0.10.0
libtpu: 0.0.40
codegen_flags: <defaults>
</compile_context>

<pallas_src>
import jax
import jax.numpy as jnp
from jax.experimental import pallas as pl
from jax.experimental.pallas import tpu as pltpu


def _round_up(x, m):
    return ((x + m - 1) // m) * m


def char_gru_kernel(x_ref, h0_ref, wih_ref, whh_ref, bgi_ref, bhn_ref,
                    wfc_ref, bfc_ref, logits_ref, hout_ref, gi_scr, h_scr):
    Bp, Hp = h0_ref.shape
    T = x_ref.shape[0] // Bp

    # --- Preamble: input projection for ALL timesteps in one MXU matmul. -----
    # bgi already contains b_ih (all gates) + b_hh (r and z gates only).
    gi_scr[...] = (jnp.dot(x_ref[...], wih_ref[...],
                           preferred_element_type=jnp.float32) + bgi_ref[...])

    # Recurrent state lives in VMEM scratch for the whole sequence.
    h_scr[...] = h0_ref[...]
    bhn = bhn_ref[...]                              # (1, Hp), b_hh of the n gate

    def step(t, carry):
        row = pl.multiple_of(t * Bp, Bp)
        gi = gi_scr[pl.ds(row, Bp), :]              # (Bp, 3*Hp), gates lane-aligned
        h_prev = h_scr[...]                         # (Bp, Hp)
        gh = jnp.dot(h_prev, whh_ref[...],          # (Bp, 3*Hp), no bias here
                     preferred_element_type=jnp.float32)
        # torch.nn.GRU gate order: reset, update, new. Each gate occupies one
        # 128-lane-aligned block of width Hp -> whole-vreg slices.
        r = jax.nn.sigmoid(gi[:, 0 * Hp:1 * Hp] + gh[:, 0 * Hp:1 * Hp])
        z = jax.nn.sigmoid(gi[:, 1 * Hp:2 * Hp] + gh[:, 1 * Hp:2 * Hp])
        n = jnp.tanh(gi[:, 2 * Hp:3 * Hp] + r * (gh[:, 2 * Hp:3 * Hp] + bhn))
        h_scr[...] = (1.0 - z) * n + z * h_prev
        return carry

    jax.lax.fori_loop(0, T, step, 0, unroll=True)

    h_fin = h_scr[...]
    hout_ref[...] = h_fin
    logits_ref[...] = (jnp.dot(h_fin, wfc_ref[...],
                               preferred_element_type=jnp.float32) + bfc_ref[...])


def char_gru_forward(x_tokens, hidden, params):
    """x_tokens: (B, T) int32, hidden: (1, B, H) f32 -> (logits (B, O), hidden (1, B, H))."""
    emb, w_ih, w_hh, b_ih, b_hh, w_fc, b_fc = (
        params["emb"], params["w_ih"], params["w_hh"], params["b_ih"],
        params["b_hh"], params["w_fc"], params["b_fc"])

    B, T = x_tokens.shape
    H = emb.shape[1]
    O = w_fc.shape[0]
    assert T >= 1, "CharGRU forward requires at least one timestep"

    Bp = _round_up(B, 8)      # sublane alignment
    Hp = _round_up(H, 128)    # lane alignment
    Op = _round_up(O, 128)    # lane-dense logits output

    # --- Glue: embedding gather + pad to a lane-dense (T*Bp, Hp) VMEM slab ---
    embedded = jnp.take(emb, x_tokens, axis=0)               # (B, T, H)
    embedded = jnp.transpose(embedded, (1, 0, 2))            # (T, B, H)
    embedded = jnp.pad(embedded, ((0, 0), (0, Bp - B), (0, Hp - H)))
    x_pad = embedded.reshape(T * Bp, Hp).astype(jnp.float32)

    h0 = jnp.pad(hidden[0], ((0, Bp - B), (0, Hp - H))).astype(jnp.float32)

    def pad_gate_w(w):
        # w: (3H, H) torch layout, gates stacked [r|z|n] along rows.
        blocks = []
        for k in range(3):
            wk = w[k * H:(k + 1) * H, :].T                   # (H, H), input-major
            blocks.append(jnp.pad(wk, ((0, Hp - H), (0, Hp - H))))
        return jnp.concatenate(blocks, axis=1).astype(jnp.float32)   # (Hp, 3*Hp)

    def pad_vec(v):
        return jnp.pad(v, (0, Hp - H))

    wih_p = pad_gate_w(w_ih)
    whh_p = pad_gate_w(w_hh)
    # Combined gi bias: b_ih for all gates + b_hh for r,z gates (n's b_hh stays
    # inside the r*(...) term per torch.nn.GRU semantics).
    bgi_p = jnp.concatenate([
        pad_vec(b_ih[0 * H:1 * H] + b_hh[0 * H:1 * H]),
        pad_vec(b_ih[1 * H:2 * H] + b_hh[1 * H:2 * H]),
        pad_vec(b_ih[2 * H:3 * H]),
    ])[None, :].astype(jnp.float32)                                   # (1, 3*Hp)
    bhn_p = pad_vec(b_hh[2 * H:3 * H])[None, :].astype(jnp.float32)   # (1, Hp)
    wfc_p = jnp.pad(w_fc.T, ((0, Hp - H), (0, Op - O))).astype(jnp.float32)  # (Hp, Op)
    bfc_p = jnp.pad(b_fc, (0, Op - O))[None, :].astype(jnp.float32)          # (1, Op)

    grid_spec = pltpu.PrefetchScalarGridSpec(
        num_scalar_prefetch=0,
        grid=(1,),  # single invocation: whole problem is VMEM-resident
        in_specs=[
            pl.BlockSpec((T * Bp, Hp), lambda i: (0, 0)),     # embedded sequence
            pl.BlockSpec((Bp, Hp), lambda i: (0, 0)),         # h0
            pl.BlockSpec((Hp, 3 * Hp), lambda i: (0, 0)),     # W_ih^T (gate-aligned)
            pl.BlockSpec((Hp, 3 * Hp), lambda i: (0, 0)),     # W_hh^T (gate-aligned)
            pl.BlockSpec((1, 3 * Hp), lambda i: (0, 0)),      # combined gi bias
            pl.BlockSpec((1, Hp), lambda i: (0, 0)),          # b_hh (n gate)
            pl.BlockSpec((Hp, Op), lambda i: (0, 0)),         # W_fc^T
            pl.BlockSpec((1, Op), lambda i: (0, 0)),          # b_fc
        ],
        out_specs=[
            pl.BlockSpec((Bp, Op), lambda i: (0, 0)),         # logits (lane-dense)
            pl.BlockSpec((Bp, Hp), lambda i: (0, 0)),         # final hidden
        ],
        scratch_shapes=[
            pltpu.VMEM((T * Bp, 3 * Hp), jnp.float32),        # gi for all timesteps
            pltpu.VMEM((Bp, Hp), jnp.float32),                # recurrent state
        ],
    )

    logits_p, h_p = pl.pallas_call(
        char_gru_kernel,
        out_shape=(jax.ShapeDtypeStruct((Bp, Op), jnp.float32),
                   jax.ShapeDtypeStruct((Bp, Hp), jnp.float32)),
        grid_spec=grid_spec,
        compiler_params=pltpu.CompilerParams(
            dimension_semantics=("arbitrary",)),
    )(x_pad, h0, wih_p, whh_p, bgi_p, bhn_p, wfc_p, bfc_p)

    logits = logits_p[:B, :O]
    h_final = h_p[:B, :H]
    return logits, h_final[None, :, :]


def reference_forward(x_tokens, hidden, params):
    """Pure-JAX reference matching torch.nn.GRU semantics, for correctness check."""
    emb, w_ih, w_hh, b_ih, b_hh, w_fc, b_fc = (
        params["emb"], params["w_ih"], params["w_hh"], params["b_ih"],
        params["b_hh"], params["w_fc"], params["b_fc"])
    H = emb.shape[1]
    embedded = jnp.take(emb, x_tokens, axis=0)  # (B, T, H)
    h = hidden[0]

    def step(h, x_t):
        gi = x_t @ w_ih.T + b_ih
        gh = h @ w_hh.T + b_hh
        r = jax.nn.sigmoid(gi[:, :H] + gh[:, :H])
        z = jax.nn.sigmoid(gi[:, H:2 * H] + gh[:, H:2 * H])
        n = jnp.tanh(gi[:, 2 * H:] + r * gh[:, 2 * H:])
        h_new = (1.0 - z) * n + z * h
        return h_new, h_new

    h_final, _ = jax.lax.scan(step, h, jnp.transpose(embedded, (1, 0, 2)))
    logits = h_final @ w_fc.T + b_fc
    return logits, h_final[None]


def init_params(key, input_size, hidden_size, output_size):
    ks = jax.random.split(key, 7)
    s = 1.0 / jnp.sqrt(hidden_size)
    return {
        "emb":  jax.random.normal(ks[0], (input_size, hidden_size), jnp.float32),
        "w_ih": jax.random.uniform(ks[1], (3 * hidden_size, hidden_size), jnp.float32, -s, s),
        "w_hh": jax.random.uniform(ks[2], (3 * hidden_size, hidden_size), jnp.float32, -s, s),
        "b_ih": jax.random.uniform(ks[3], (3 * hidden_size,), jnp.float32, -s, s),
        "b_hh": jax.random.uniform(ks[4], (3 * hidden_size,), jnp.float32, -s, s),
        "w_fc": jax.random.uniform(ks[5], (output_size, hidden_size), jnp.float32, -s, s),
        "b_fc": jax.random.uniform(ks[6], (output_size,), jnp.float32, -s, s),
    }


if __name__ == "__main__":
    # Small synthetic config (vocab like tinyshakespeare ~65 chars)
    input_size = 65     # vocab size
    hidden_size = 32
    output_size = 65
    batch = 2
    seq = 8

    key = jax.random.PRNGKey(0)
    k_tok, k_par = jax.random.split(key)
    params = init_params(k_par, input_size, hidden_size, output_size)

    x_tokens = jax.random.randint(k_tok, (batch, seq), 0, input_size, dtype=jnp.int32)
    hidden0 = jnp.zeros((1, batch, hidden_size), jnp.float32)  # init_hidden

    logits, h_out = char_gru_forward(x_tokens, hidden0, params)
    logits = jax.block_until_ready(logits)
    h_out = jax.block_until_ready(h_out)

    ref_logits, ref_h = reference_forward(x_tokens, hidden0, params)
    assert jnp.allclose(logits, ref_logits, atol=1e-4, rtol=1e-4)
    assert jnp.allclose(h_out, ref_h, atol=1e-4, rtol=1e-4)
    assert logits.shape == (batch, output_size) and h_out.shape == (1, batch, hidden_size)

    print("KERNEL_OK")
</pallas_src>

<mosaic_0001>
module attributes {stable_mosaic.version = 11 : i64} {
  func.func @char_gru_kernel(%arg0: i32, %arg1: memref<64x128xf32, #tpu.memory_space<vmem>>, %arg2: memref<8x128xf32, #tpu.memory_space<vmem>>, %arg3: memref<128x384xf32, #tpu.memory_space<vmem>>, %arg4: memref<128x384xf32, #tpu.memory_space<vmem>>, %arg5: memref<1x384xf32, #tpu.memory_space<vmem>>, %arg6: memref<1x128xf32, #tpu.memory_space<vmem>>, %arg7: memref<128x128xf32, #tpu.memory_space<vmem>>, %arg8: memref<1x128xf32, #tpu.memory_space<vmem>>, %arg9: memref<8x128xf32, #tpu.memory_space<vmem>>, %arg10: memref<8x128xf32, #tpu.memory_space<vmem>>, %arg11: memref<64x384xf32, #tpu.memory_space<vmem>>, %arg12: memref<8x128xf32, #tpu.memory_space<vmem>>) attributes {dimension_semantics = [#tpu.dimension_semantics<arbitrary>], iteration_bounds = array<i64: 1>, scalar_prefetch = 0 : i64, scratch_operands = 2 : i64, tpu.core_type = #tpu.core_type<tc>, window_params = [{pipeline_mode = #tpu.pipeline_mode<synchronous>, transform_indices = @transform_0, window_bounds = array<i64: 64, 128>}, {pipeline_mode = #tpu.pipeline_mode<synchronous>, transform_indices = @transform_1, window_bounds = array<i64: 8, 128>}, {pipeline_mode = #tpu.pipeline_mode<synchronous>, transform_indices = @transform_2, window_bounds = array<i64: 128, 384>}, {pipeline_mode = #tpu.pipeline_mode<synchronous>, transform_indices = @transform_3, window_bounds = array<i64: 128, 384>}, {pipeline_mode = #tpu.pipeline_mode<synchronous>, transform_indices = @transform_4, window_bounds = array<i64: 1, 384>}, {pipeline_mode = #tpu.pipeline_mode<synchronous>, transform_indices = @transform_5, window_bounds = array<i64: 1, 128>}, {pipeline_mode = #tpu.pipeline_mode<synchronous>, transform_indices = @transform_6, window_bounds = array<i64: 128, 128>}, {pipeline_mode = #tpu.pipeline_mode<synchronous>, transform_indices = @transform_7, window_bounds = array<i64: 1, 128>}, {pipeline_mode = #tpu.pipeline_mode<synchronous>, transform_indices = @transform_8, window_bounds = array<i64: 8, 128>}, {pipeline_mode = #tpu.pipeline_mode<synchronous>, transform_indices = @transform_9, window_bounds = array<i64: 8, 128>}]} {
    %c0 = arith.constant 0 : index
    %c0_0 = arith.constant 0 : index
    %0 = vector.load %arg1[%c0, %c0_0] : memref<64x128xf32, #tpu.memory_space<vmem>>, vector<64x128xf32>
    %c0_1 = arith.constant 0 : index
    %c0_2 = arith.constant 0 : index
    %1 = vector.load %arg3[%c0_1, %c0_2] : memref<128x384xf32, #tpu.memory_space<vmem>>, vector<128x384xf32>
    %cst = arith.constant dense<0.000000e+00> : vector<64x384xf32>
    %2 = tpu.matmul %0, %1, %cst {dimension_numbers = #tpu.dot_dimension_numbers<[1], [0], [0], [1], [0, 0, 1, 1], [], []>} : vector<64x128xf32>, vector<128x384xf32>, vector<64x384xf32> -> vector<64x384xf32>
    %c0_3 = arith.constant 0 : index
    %c0_4 = arith.constant 0 : index
    %3 = vector.load %arg5[%c0_3, %c0_4] : memref<1x384xf32, #tpu.memory_space<vmem>>, vector<1x384xf32>
    %4 = vector.broadcast %3 : vector<1x384xf32> to vector<64x384xf32>
    %5 = arith.addf %2, %4 : vector<64x384xf32>
    %c0_5 = arith.constant 0 : index
    %c0_6 = arith.constant 0 : index
    %6 = vector.load %arg11[%c0_5, %c0_6] : memref<64x384xf32, #tpu.memory_space<vmem>>, vector<64x384xf32>
    tpu.vector_store %arg11[%c0_5, %c0_6], %5 {strides = array<i32>} : memref<64x384xf32, #tpu.memory_space<vmem>>, vector<64x384xf32>,
    %c0_7 = arith.constant 0 : index
    %c0_8 = arith.constant 0 : index
    %7 = vector.load %arg2[%c0_7, %c0_8] : memref<8x128xf32, #tpu.memory_space<vmem>>, vector<8x128xf32>
    %c0_9 = arith.constant 0 : index
    %c0_10 = arith.constant 0 : index
    %8 = vector.load %arg12[%c0_9, %c0_10] : memref<8x128xf32, #tpu.memory_space<vmem>>, vector<8x128xf32>
    tpu.vector_store %arg12[%c0_9, %c0_10], %7 {strides = array<i32>} : memref<8x128xf32, #tpu.memory_space<vmem>>, vector<8x128xf32>,
    %c0_11 = arith.constant 0 : index
    %c0_12 = arith.constant 0 : index
    %9 = vector.load %arg6[%c0_11, %c0_12] : memref<1x128xf32, #tpu.memory_space<vmem>>, vector<1x128xf32>
    %c0_i32 = arith.constant 0 : i32
    %c8_i32 = arith.constant 8 : i32
    %10 = arith.muli %c0_i32, %c8_i32 : i32
    %11 = tpu.assume_multiple %10, 8 : i32
    %12 = arith.index_cast %11 : i32 to index
    %c0_13 = arith.constant 0 : index
    %13 = vector.load %arg11[%12, %c0_13] : memref<64x384xf32, #tpu.memory_space<vmem>>, vector<8x384xf32>
    %c0_14 = arith.constant 0 : index
    %c0_15 = arith.constant 0 : index
    %14 = vector.load %arg12[%c0_14, %c0_15] : memref<8x128xf32, #tpu.memory_space<vmem>>, vector<8x128xf32>
    %c0_16 = arith.constant 0 : index
    %c0_17 = arith.constant 0 : index
    %15 = vector.load %arg4[%c0_16, %c0_17] : memref<128x384xf32, #tpu.memory_space<vmem>>, vector<128x384xf32>
    %cst_18 = arith.constant dense<0.000000e+00> : vector<8x384xf32>
    %16 = tpu.matmul %14, %15, %cst_18 {dimension_numbers = #tpu.dot_dimension_numbers<[1], [0], [0], [1], [0, 0, 1, 1], [], []>} : vector<8x128xf32>, vector<128x384xf32>, vector<8x384xf32> -> vector<8x384xf32>
    %17 = vector.extract_strided_slice %13 {offsets = [0, 0], sizes = [8, 128], strides = [1, 1]} : vector<8x384xf32> to vector<8x128xf32>
    %18 = vector.extract_strided_slice %16 {offsets = [0, 0], sizes = [8, 128], strides = [1, 1]} : vector<8x384xf32> to vector<8x128xf32>
    %19 = arith.addf %17, %18 : vector<8x128xf32>
    %20 = arith.negf %19 : vector<8x128xf32>
    %21 = math.exp %20 : vector<8x128xf32>
    %cst_19 = arith.constant 1.000000e+00 : f32
    %22 = vector.broadcast %cst_19 : f32 to vector<8x128xf32>
    %23 = arith.addf %22, %21 : vector<8x128xf32>
    %24 = arith.divf %22, %23 : vector<8x128xf32>
    %25 = vector.extract_strided_slice %13 {offsets = [0, 128], sizes = [8, 128], strides = [1, 1]} : vector<8x384xf32> to vector<8x128xf32>
    %26 = vector.extract_strided_slice %16 {offsets = [0, 128], sizes = [8, 128], strides = [1, 1]} : vector<8x384xf32> to vector<8x128xf32>
    %27 = arith.addf %25, %26 : vector<8x128xf32>
    %28 = arith.negf %27 : vector<8x128xf32>
    %29 = math.exp %28 : vector<8x128xf32>
    %cst_20 = arith.constant 1.000000e+00 : f32
    %30 = vector.broadcast %cst_20 : f32 to vector<8x128xf32>
    %31 = arith.addf %30, %29 : vector<8x128xf32>
    %32 = arith.divf %30, %31 : vector<8x128xf32>
    %33 = vector.extract_strided_slice %13 {offsets = [0, 256], sizes = [8, 128], strides = [1, 1]} : vector<8x384xf32> to vector<8x128xf32>
    %34 = vector.extract_strided_slice %16 {offsets = [0, 256], sizes = [8, 128], strides = [1, 1]} : vector<8x384xf32> to vector<8x128xf32>
    %35 = vector.broadcast %9 : vector<1x128xf32> to vector<8x128xf32>
    %36 = arith.addf %34, %35 : vector<8x128xf32>
    %37 = arith.mulf %24, %36 : vector<8x128xf32>
    %38 = arith.addf %33, %37 : vector<8x128xf32>
    %39 = math.tanh %38 : vector<8x128xf32>
    %cst_21 = arith.constant 1.000000e+00 : f32
    %40 = vector.broadcast %cst_21 : f32 to vector<8x128xf32>
    %41 = arith.subf %40, %32 : vector<8x128xf32>
    %42 = arith.mulf %41, %39 : vector<8x128xf32>
    %43 = arith.mulf %32, %14 : vector<8x128xf32>
    %44 = arith.addf %42, %43 : vector<8x128xf32>
    %c0_22 = arith.constant 0 : index
    %c0_23 = arith.constant 0 : index
    %45 = vector.load %arg12[%c0_22, %c0_23] : memref<8x128xf32, #tpu.memory_space<vmem>>, vector<8x128xf32>
    tpu.vector_store %arg12[%c0_22, %c0_23], %44 {strides = array<i32>} : memref<8x128xf32, #tpu.memory_space<vmem>>, vector<8x128xf32>,
    %c1_i32 = arith.constant 1 : i32
    %c8_i32_24 = arith.constant 8 : i32
    %46 = arith.muli %c1_i32, %c8_i32_24 : i32
    %47 = tpu.assume_multiple %46, 8 : i32
    %48 = arith.index_cast %47 : i32 to index
    %c0_25 = arith.constant 0 : index
    %49 = vector.load %arg11[%48, %c0_25] : memref<64x384xf32, #tpu.memory_space<vmem>>, vector<8x384xf32>
    %c0_26 = arith.constant 0 : index
    %c0_27 = arith.constant 0 : index
    %50 = vector.load %arg12[%c0_26, %c0_27] : memref<8x128xf32, #tpu.memory_space<vmem>>, vector<8x128xf32>
    %c0_28 = arith.constant 0 : index
    %c0_29 = arith.constant 0 : index
    %51 = vector.load %arg4[%c0_28, %c0_29] : memref<128x384xf32, #tpu.memory_space<vmem>>, vector<128x384xf32>
    %cst_30 = arith.constant dense<0.000000e+00> : vector<8x384xf32>
    %52 = tpu.matmul %50, %51, %cst_30 {dimension_numbers = #tpu.dot_dimension_numbers<[1], [0], [0], [1], [0, 0, 1, 1], [], []>} : vector<8x128xf32>, vector<128x384xf32>, vector<8x384xf32> -> vector<8x384xf32>
    %53 = vector.extract_strided_slice %49 {offsets = [0, 0], sizes = [8, 128], strides = [1, 1]} : vector<8x384xf32> to vector<8x128xf32>
    %54 = vector.extract_strided_slice %52 {offsets = [0, 0], sizes = [8, 128], strides = [1, 1]} : vector<8x384xf32> to vector<8x128xf32>
    %55 = arith.addf %53, %54 : vector<8x128xf32>
    %56 = arith.negf %55 : vector<8x128xf32>
    %57 = math.exp %56 : vector<8x128xf32>
    %cst_31 = arith.constant 1.000000e+00 : f32
    %58 = vector.broadcast %cst_31 : f32 to vector<8x128xf32>
    %59 = arith.addf %58, %57 : vector<8x128xf32>
    %60 = arith.divf %58, %59 : vector<8x128xf32>
    %61 = vector.extract_strided_slice %49 {offsets = [0, 128], sizes = [8, 128], strides = [1, 1]} : vector<8x384xf32> to vector<8x128xf32>
    %62 = vector.extract_strided_slice %52 {offsets = [0, 128], sizes = [8, 128], strides = [1, 1]} : vector<8x384xf32> to vector<8x128xf32>
    %63 = arith.addf %61, %62 : vector<8x128xf32>
    %64 = arith.negf %63 : vector<8x128xf32>
    %65 = math.exp %64 : vector<8x128xf32>
    %cst_32 = arith.constant 1.000000e+00 : f32
    %66 = vector.broadcast %cst_32 : f32 to vector<8x128xf32>
    %67 = arith.addf %66, %65 : vector<8x128xf32>
    %68 = arith.divf %66, %67 : vector<8x128xf32>
    %69 = vector.extract_strided_slice %49 {offsets = [0, 256], sizes = [8, 128], strides = [1, 1]} : vector<8x384xf32> to vector<8x128xf32>
    %70 = vector.extract_strided_slice %52 {offsets = [0, 256], sizes = [8, 128], strides = [1, 1]} : vector<8x384xf32> to vector<8x128xf32>
    %71 = vector.broadcast %9 : vector<1x128xf32> to vector<8x128xf32>
    %72 = arith.addf %70, %71 : vector<8x128xf32>
    %73 = arith.mulf %60, %72 : vector<8x128xf32>
    %74 = arith.addf %69, %73 : vector<8x128xf32>
    %75 = math.tanh %74 : vector<8x128xf32>
    %cst_33 = arith.constant 1.000000e+00 : f32
    %76 = vector.broadcast %cst_33 : f32 to vector<8x128xf32>
    %77 = arith.subf %76, %68 : vector<8x128xf32>
    %78 = arith.mulf %77, %75 : vector<8x128xf32>
    %79 = arith.mulf %68, %50 : vector<8x128xf32>
    %80 = arith.addf %78, %79 : vector<8x128xf32>
    %c0_34 = arith.constant 0 : index
    %c0_35 = arith.constant 0 : index
    %81 = vector.load %arg12[%c0_34, %c0_35] : memref<8x128xf32, #tpu.memory_space<vmem>>, vector<8x128xf32>
    tpu.vector_store %arg12[%c0_34, %c0_35], %80 {strides = array<i32>} : memref<8x128xf32, #tpu.memory_space<vmem>>, vector<8x128xf32>,
    %c2_i32 = arith.constant 2 : i32
    %c8_i32_36 = arith.constant 8 : i32
    %82 = arith.muli %c2_i32, %c8_i32_36 : i32
    %83 = tpu.assume_multiple %82, 8 : i32
    %84 = arith.index_cast %83 : i32 to index
    %c0_37 = arith.constant 0 : index
    %85 = vector.load %arg11[%84, %c0_37] : memref<64x384xf32, #tpu.memory_space<vmem>>, vector<8x384xf32>
    %c0_38 = arith.constant 0 : index
    %c0_39 = arith.constant 0 : index
    %86 = vector.load %arg12[%c0_38, %c0_39] : memref<8x128xf32, #tpu.memory_space<vmem>>, vector<8x128xf32>
    %c0_40 = arith.constant 0 : index
    %c0_41 = arith.constant 0 : index
    %87 = vector.load %arg4[%c0_40, %c0_41] : memref<128x384xf32, #tpu.memory_space<vmem>>, vector<128x384xf32>
    %cst_42 = arith.constant dense<0.000000e+00> : vector<8x384xf32>
    %88 = tpu.matmul %86, %87, %cst_42 {dimension_numbers = #tpu.dot_dimension_numbers<[1], [0], [0], [1], [0, 0, 1, 1], [], []>} : vector<8x128xf32>, vector<128x384xf32>, vector<8x384xf32> -> vector<8x384xf32>
    %89 = vector.extract_strided_slice %85 {offsets = [0, 0], sizes = [8, 128], strides = [1, 1]} : vector<8x384xf32> to vector<8x128xf32>
    %90 = vector.extract_strided_slice %88 {offsets = [0, 0], sizes = [8, 128], strides = [1, 1]} : vector<8x384xf32> to vector<8x128xf32>
    %91 = arith.addf %89, %90 : vector<8x128xf32>
    %92 = arith.negf %91 : vector<8x128xf32>
    %93 = math.exp %92 : vector<8x128xf32>
    %cst_43 = arith.constant 1.000000e+00 : f32
    %94 = vector.broadcast %cst_43 : f32 to vector<8x128xf32>
    %95 = arith.addf %94, %93 : vector<8x128xf32>
    %96 = arith.divf %94, %95 : vector<8x128xf32>
    %97 = vector.extract_strided_slice %85 {offsets = [0, 128], sizes = [8, 128], strides = [1, 1]} : vector<8x384xf32> to vector<8x128xf32>
    %98 = vector.extract_strided_slice %88 {offsets = [0, 128], sizes = [8, 128], strides = [1, 1]} : vector<8x384xf32> to vector<8x128xf32>
    %99 = arith.addf %97, %98 : vector<8x128xf32>
    %100 = arith.negf %99 : vector<8x128xf32>
    %101 = math.exp %100 : vector<8x128xf32>
    %cst_44 = arith.constant 1.000000e+00 : f32
    %102 = vector.broadcast %cst_44 : f32 to vector<8x128xf32>
    %103 = arith.addf %102, %101 : vector<8x128xf32>
    %104 = arith.divf %102, %103 : vector<8x128xf32>
    %105 = vector.extract_strided_slice %85 {offsets = [0, 256], sizes = [8, 128], strides = [1, 1]} : vector<8x384xf32> to vector<8x128xf32>
    %106 = vector.extract_strided_slice %88 {offsets = [0, 256], sizes = [8, 128], strides = [1, 1]} : vector<8x384xf32> to vector<8x128xf32>
    %107 = vector.broadcast %9 : vector<1x128xf32> to vector<8x128xf32>
    %108 = arith.addf %106, %107 : vector<8x128xf32>
    %109 = arith.mulf %96, %108 : vector<8x128xf32>
    %110 = arith.addf %105, %109 : vector<8x128xf32>
    %111 = math.tanh %110 : vector<8x128xf32>
    %cst_45 = arith.constant 1.000000e+00 : f32
    %112 = vector.broadcast %cst_45 : f32 to vector<8x128xf32>
    %113 = arith.subf %112, %104 : vector<8x128xf32>
    %114 = arith.mulf %113, %111 : vector<8x128xf32>
    %115 = arith.mulf %104, %86 : vector<8x128xf32>
    %116 = arith.addf %114, %115 : vector<8x128xf32>
    %c0_46 = arith.constant 0 : index
    %c0_47 = arith.constant 0 : index
    %117 = vector.load %arg12[%c0_46, %c0_47] : memref<8x128xf32, #tpu.memory_space<vmem>>, vector<8x128xf32>
    tpu.vector_store %arg12[%c0_46, %c0_47], %116 {strides = array<i32>} : memref<8x128xf32, #tpu.memory_space<vmem>>, vector<8x128xf32>,
    %c3_i32 = arith.constant 3 : i32
    %c8_i32_48 = arith.constant 8 : i32
    %118 = arith.muli %c3_i32, %c8_i32_48 : i32
    %119 = tpu.assume_multiple %118, 8 : i32
    %120 = arith.index_cast %119 : i32 to index
    %c0_49 = arith.constant 0 : index
    %121 = vector.load %arg11[%120, %c0_49] : memref<64x384xf32, #tpu.memory_space<vmem>>, vector<8x384xf32>
    %c0_50 = arith.constant 0 : index
    %c0_51 = arith.constant 0 : index
    %122 = vector.load %arg12[%c0_50, %c0_51] : memref<8x128xf32, #tpu.memory_space<vmem>>, vector<8x128xf32>
    %c0_52 = arith.constant 0 : index
    %c0_53 = arith.constant 0 : index
    %123 = vector.load %arg4[%c0_52, %c0_53] : memref<128x384xf32, #tpu.memory_space<vmem>>, vector<128x384xf32>
    %cst_54 = arith.constant dense<0.000000e+00> : vector<8x384xf32>
    %124 = tpu.matmul %122, %123, %cst_54 {dimension_numbers = #tpu.dot_dimension_numbers<[1], [0], [0], [1], [0, 0, 1, 1], [], []>} : vector<8x128xf32>, vector<128x384xf32>, vector<8x384xf32> -> vector<8x384xf32>
    %125 = vector.extract_strided_slice %121 {offsets = [0, 0], sizes = [8, 128], strides = [1, 1]} : vector<8x384xf32> to vector<8x128xf32>
    %126 = vector.extract_strided_slice %124 {offsets = [0, 0], sizes = [8, 128], strides = [1, 1]} : vector<8x384xf32> to vector<8x128xf32>
    %127 = arith.addf %125, %126 : vector<8x128xf32>
    %128 = arith.negf %127 : vector<8x128xf32>
    %129 = math.exp %128 : vector<8x128xf32>
    %cst_55 = arith.constant 1.000000e+00 : f32
    %130 = vector.broadcast %cst_55 : f32 to vector<8x128xf32>
    %131 = arith.addf %130, %129 : vector<8x128xf32>
    %132 = arith.divf %130, %131 : vector<8x128xf32>
    %133 = vector.extract_strided_slice %121 {offsets = [0, 128], sizes = [8, 128], strides = [1, 1]} : vector<8x384xf32> to vector<8x128xf32>
    %134 = vector.extract_strided_slice %124 {offsets = [0, 128], sizes = [8, 128], strides = [1, 1]} : vector<8x384xf32> to vector<8x128xf32>
    %135 = arith.addf %133, %134 : vector<8x128xf32>
    %136 = arith.negf %135 : vector<8x128xf32>
    %137 = math.exp %136 : vector<8x128xf32>
    %cst_56 = arith.constant 1.000000e+00 : f32
    %138 = vector.broadcast %cst_56 : f32 to vector<8x128xf32>
    %139 = arith.addf %138, %137 : vector<8x128xf32>
    %140 = arith.divf %138, %139 : vector<8x128xf32>
    %141 = vector.extract_strided_slice %121 {offsets = [0, 256], sizes = [8, 128], strides = [1, 1]} : vector<8x384xf32> to vector<8x128xf32>
    %142 = vector.extract_strided_slice %124 {offsets = [0, 256], sizes = [8, 128], strides = [1, 1]} : vector<8x384xf32> to vector<8x128xf32>
    %143 = vector.broadcast %9 : vector<1x128xf32> to vector<8x128xf32>
    %144 = arith.addf %142, %143 : vector<8x128xf32>
    %145 = arith.mulf %132, %144 : vector<8x128xf32>
    %146 = arith.addf %141, %145 : vector<8x128xf32>
    %147 = math.tanh %146 : vector<8x128xf32>
    %cst_57 = arith.constant 1.000000e+00 : f32
    %148 = vector.broadcast %cst_57 : f32 to vector<8x128xf32>
    %149 = arith.subf %148, %140 : vector<8x128xf32>
    %150 = arith.mulf %149, %147 : vector<8x128xf32>
    %151 = arith.mulf %140, %122 : vector<8x128xf32>
    %152 = arith.addf %150, %151 : vector<8x128xf32>
    %c0_58 = arith.constant 0 : index
    %c0_59 = arith.constant 0 : index
    %153 = vector.load %arg12[%c0_58, %c0_59] : memref<8x128xf32, #tpu.memory_space<vmem>>, vector<8x128xf32>
    tpu.vector_store %arg12[%c0_58, %c0_59], %152 {strides = array<i32>} : memref<8x128xf32, #tpu.memory_space<vmem>>, vector<8x128xf32>,
    %c4_i32 = arith.constant 4 : i32
    %c8_i32_60 = arith.constant 8 : i32
    %154 = arith.muli %c4_i32, %c8_i32_60 : i32
    %155 = tpu.assume_multiple %154, 8 : i32
    %156 = arith.index_cast %155 : i32 to index
    %c0_61 = arith.constant 0 : index
    %157 = vector.load %arg11[%156, %c0_61] : memref<64x384xf32, #tpu.memory_space<vmem>>, vector<8x384xf32>
    %c0_62 = arith.constant 0 : index
    %c0_63 = arith.constant 0 : index
    %158 = vector.load %arg12[%c0_62, %c0_63] : memref<8x128xf32, #tpu.memory_space<vmem>>, vector<8x128xf32>
    %c0_64 = arith.constant 0 : index
    %c0_65 = arith.constant 0 : index
    %159 = vector.load %arg4[%c0_64, %c0_65] : memref<128x384xf32, #tpu.memory_space<vmem>>, vector<128x384xf32>
    %cst_66 = arith.constant dense<0.000000e+00> : vector<8x384xf32>
    %160 = tpu.matmul %158, %159, %cst_66 {dimension_numbers = #tpu.dot_dimension_numbers<[1], [0], [0], [1], [0, 0, 1, 1], [], []>} : vector<8x128xf32>, vector<128x384xf32>, vector<8x384xf32> -> vector<8x384xf32>
    %161 = vector.extract_strided_slice %157 {offsets = [0, 0], sizes = [8, 128], strides = [1, 1]} : vector<8x384xf32> to vector<8x128xf32>
    %162 = vector.extract_strided_slice %160 {offsets = [0, 0], sizes = [8, 128], strides = [1, 1]} : vector<8x384xf32> to vector<8x128xf32>
    %163 = arith.addf %161, %162 : vector<8x128xf32>
    %164 = arith.negf %163 : vector<8x128xf32>
    %165 = math.exp %164 : vector<8x128xf32>
    %cst_67 = arith.constant 1.000000e+00 : f32
    %166 = vector.broadcast %cst_67 : f32 to vector<8x128xf32>
    %167 = arith.addf %166, %165 : vector<8x128xf32>
    %168 = arith.divf %166, %167 : vector<8x128xf32>
    %169 = vector.extract_strided_slice %157 {offsets = [0, 128], sizes = [8, 128], strides = [1, 1]} : vector<8x384xf32> to vector<8x128xf32>
    %170 = vector.extract_strided_slice %160 {offsets = [0, 128], sizes = [8, 128], strides = [1, 1]} : vector<8x384xf32> to vector<8x128xf32>
    %171 = arith.addf %169, %170 : vector<8x128xf32>
    %172 = arith.negf %171 : vector<8x128xf32>
    %173 = math.exp %172 : vector<8x128xf32>
    %cst_68 = arith.constant 1.000000e+00 : f32
    %174 = vector.broadcast %cst_68 : f32 to vector<8x128xf32>
    %175 = arith.addf %174, %173 : vector<8x128xf32>
    %176 = arith.divf %174, %175 : vector<8x128xf32>
    %177 = vector.extract_strided_slice %157 {offsets = [0, 256], sizes = [8, 128], strides = [1, 1]} : vector<8x384xf32> to vector<8x128xf32>
    %178 = vector.extract_strided_slice %160 {offsets = [0, 256], sizes = [8, 128], strides = [1, 1]} : vector<8x384xf32> to vector<8x128xf32>
    %179 = vector.broadcast %9 : vector<1x128xf32> to vector<8x128xf32>
    %180 = arith.addf %178, %179 : vector<8x128xf32>
    %181 = arith.mulf %168, %180 : vector<8x128xf32>
    %182 = arith.addf %177, %181 : vector<8x128xf32>
    %183 = math.tanh %182 : vector<8x128xf32>
    %cst_69 = arith.constant 1.000000e+00 : f32
    %184 = vector.broadcast %cst_69 : f32 to vector<8x128xf32>
    %185 = arith.subf %184, %176 : vector<8x128xf32>
    %186 = arith.mulf %185, %183 : vector<8x128xf32>
    %187 = arith.mulf %176, %158 : vector<8x128xf32>
    %188 = arith.addf %186, %187 : vector<8x128xf32>
    %c0_70 = arith.constant 0 : index
    %c0_71 = arith.constant 0 : index
    %189 = vector.load %arg12[%c0_70, %c0_71] : memref<8x128xf32, #tpu.memory_space<vmem>>, vector<8x128xf32>
    tpu.vector_store %arg12[%c0_70, %c0_71], %188 {strides = array<i32>} : memref<8x128xf32, #tpu.memory_space<vmem>>, vector<8x128xf32>,
    %c5_i32 = arith.constant 5 : i32
    %c8_i32_72 = arith.constant 8 : i32
    %190 = arith.muli %c5_i32, %c8_i32_72 : i32
    %191 = tpu.assume_multiple %190, 8 : i32
    %192 = arith.index_cast %191 : i32 to index
    %c0_73 = arith.constant 0 : index
    %193 = vector.load %arg11[%192, %c0_73] : memref<64x384xf32, #tpu.memory_space<vmem>>, vector<8x384xf32>
    %c0_74 = arith.constant 0 : index
    %c0_75 = arith.constant 0 : index
    %194 = vector.load %arg12[%c0_74, %c0_75] : memref<8x128xf32, #tpu.memory_space<vmem>>, vector<8x128xf32>
    %c0_76 = arith.constant 0 : index
    %c0_77 = arith.constant 0 : index
    %195 = vector.load %arg4[%c0_76, %c0_77] : memref<128x384xf32, #tpu.memory_space<vmem>>, vector<128x384xf32>
    %cst_78 = arith.constant dense<0.000000e+00> : vector<8x384xf32>
    %196 = tpu.matmul %194, %195, %cst_78 {dimension_numbers = #tpu.dot_dimension_numbers<[1], [0], [0], [1], [0, 0, 1, 1], [], []>} : vector<8x128xf32>, vector<128x384xf32>, vector<8x384xf32> -> vector<8x384xf32>
    %197 = vector.extract_strided_slice %193 {offsets = [0, 0], sizes = [8, 128], strides = [1, 1]} : vector<8x384xf32> to vector<8x128xf32>
    %198 = vector.extract_strided_slice %196 {offsets = [0, 0], sizes = [8, 128], strides = [1, 1]} : vector<8x384xf32> to vector<8x128xf32>
    %199 = arith.addf %197, %198 : vector<8x128xf32>
    %200 = arith.negf %199 : vector<8x128xf32>
    %201 = math.exp %200 : vector<8x128xf32>
    %cst_79 = arith.constant 1.000000e+00 : f32
    %202 = vector.broadcast %cst_79 : f32 to vector<8x128xf32>
    %203 = arith.addf %202, %201 : vector<8x128xf32>
    %204 = arith.divf %202, %203 : vector<8x128xf32>
    %205 = vector.extract_strided_slice %193 {offsets = [0, 128], sizes = [8, 128], strides = [1, 1]} : vector<8x384xf32> to vector<8x128xf32>
    %206 = vector.extract_strided_slice %196 {offsets = [0, 128], sizes = [8, 128], strides = [1, 1]} : vector<8x384xf32> to vector<8x128xf32>
    %207 = arith.addf %205, %206 : vector<8x128xf32>
    %208 = arith.negf %207 : vector<8x128xf32>
    %209 = math.exp %208 : vector<8x128xf32>
    %cst_80 = arith.constant 1.000000e+00 : f32
    %210 = vector.broadcast %cst_80 : f32 to vector<8x128xf32>
    %211 = arith.addf %210, %209 : vector<8x128xf32>
    %212 = arith.divf %210, %211 : vector<8x128xf32>
    %213 = vector.extract_strided_slice %193 {offsets = [0, 256], sizes = [8, 128], strides = [1, 1]} : vector<8x384xf32> to vector<8x128xf32>
    %214 = vector.extract_strided_slice %196 {offsets = [0, 256], sizes = [8, 128], strides = [1, 1]} : vector<8x384xf32> to vector<8x128xf32>
    %215 = vector.broadcast %9 : vector<1x128xf32> to vector<8x128xf32>
    %216 = arith.addf %214, %215 : vector<8x128xf32>
    %217 = arith.mulf %204, %216 : vector<8x128xf32>
    %218 = arith.addf %213, %217 : vector<8x128xf32>
    %219 = math.tanh %218 : vector<8x128xf32>
    %cst_81 = arith.constant 1.000000e+00 : f32
    %220 = vector.broadcast %cst_81 : f32 to vector<8x128xf32>
    %221 = arith.subf %220, %212 : vector<8x128xf32>
    %222 = arith.mulf %221, %219 : vector<8x128xf32>
    %223 = arith.mulf %212, %194 : vector<8x128xf32>
    %224 = arith.addf %222, %223 : vector<8x128xf32>
    %c0_82 = arith.constant 0 : index
    %c0_83 = arith.constant 0 : index
    %225 = vector.load %arg12[%c0_82, %c0_83] : memref<8x128xf32, #tpu.memory_space<vmem>>, vector<8x128xf32>
    tpu.vector_store %arg12[%c0_82, %c0_83], %224 {strides = array<i32>} : memref<8x128xf32, #tpu.memory_space<vmem>>, vector<8x128xf32>,
    %c6_i32 = arith.constant 6 : i32
    %c8_i32_84 = arith.constant 8 : i32
    %226 = arith.muli %c6_i32, %c8_i32_84 : i32
    %227 = tpu.assume_multiple %226, 8 : i32
    %228 = arith.index_cast %227 : i32 to index
    %c0_85 = arith.constant 0 : index
    %229 = vector.load %arg11[%228, %c0_85] : memref<64x384xf32, #tpu.memory_space<vmem>>, vector<8x384xf32>
    %c0_86 = arith.constant 0 : index
    %c0_87 = arith.constant 0 : index
    %230 = vector.load %arg12[%c0_86, %c0_87] : memref<8x128xf32, #tpu.memory_space<vmem>>, vector<8x128xf32>
    %c0_88 = arith.constant 0 : index
    %c0_89 = arith.constant 0 : index
    %231 = vector.load %arg4[%c0_88, %c0_89] : memref<128x384xf32, #tpu.memory_space<vmem>>, vector<128x384xf32>
    %cst_90 = arith.constant dense<0.000000e+00> : vector<8x384xf32>
    %232 = tpu.matmul %230, %231, %cst_90 {dimension_numbers = #tpu.dot_dimension_numbers<[1], [0], [0], [1], [0, 0, 1, 1], [], []>} : vector<8x128xf32>, vector<128x384xf32>, vector<8x384xf32> -> vector<8x384xf32>
    %233 = vector.extract_strided_slice %229 {offsets = [0, 0], sizes = [8, 128], strides = [1, 1]} : vector<8x384xf32> to vector<8x128xf32>
    %234 = vector.extract_strided_slice %232 {offsets = [0, 0], sizes = [8, 128], strides = [1, 1]} : vector<8x384xf32> to vector<8x128xf32>
    %235 = arith.addf %233, %234 : vector<8x128xf32>
    %236 = arith.negf %235 : vector<8x128xf32>
    %237 = math.exp %236 : vector<8x128xf32>
    %cst_91 = arith.constant 1.000000e+00 : f32
    %238 = vector.broadcast %cst_91 : f32 to vector<8x128xf32>
    %239 = arith.addf %238, %237 : vector<8x128xf32>
    %240 = arith.divf %238, %239 : vector<8x128xf32>
    %241 = vector.extract_strided_slice %229 {offsets = [0, 128], sizes = [8, 128], strides = [1, 1]} : vector<8x384xf32> to vector<8x128xf32>
    %242 = vector.extract_strided_slice %232 {offsets = [0, 128], sizes = [8, 128], strides = [1, 1]} : vector<8x384xf32> to vector<8x128xf32>
    %243 = arith.addf %241, %242 : vector<8x128xf32>
    %244 = arith.negf %243 : vector<8x128xf32>
    %245 = math.exp %244 : vector<8x128xf32>
    %cst_92 = arith.constant 1.000000e+00 : f32
    %246 = vector.broadcast %cst_92 : f32 to vector<8x128xf32>
    %247 = arith.addf %246, %245 : vector<8x128xf32>
    %248 = arith.divf %246, %247 : vector<8x128xf32>
    %249 = vector.extract_strided_slice %229 {offsets = [0, 256], sizes = [8, 128], strides = [1, 1]} : vector<8x384xf32> to vector<8x128xf32>
    %250 = vector.extract_strided_slice %232 {offsets = [0, 256], sizes = [8, 128], strides = [1, 1]} : vector<8x384xf32> to vector<8x128xf32>
    %251 = vector.broadcast %9 : vector<1x128xf32> to vector<8x128xf32>
    %252 = arith.addf %250, %251 : vector<8x128xf32>
    %253 = arith.mulf %240, %252 : vector<8x128xf32>
    %254 = arith.addf %249, %253 : vector<8x128xf32>
    %255 = math.tanh %254 : vector<8x128xf32>
    %cst_93 = arith.constant 1.000000e+00 : f32
    %256 = vector.broadcast %cst_93 : f32 to vector<8x128xf32>
    %257 = arith.subf %256, %248 : vector<8x128xf32>
    %258 = arith.mulf %257, %255 : vector<8x128xf32>
    %259 = arith.mulf %248, %230 : vector<8x128xf32>
    %260 = arith.addf %258, %259 : vector<8x128xf32>
    %c0_94 = arith.constant 0 : index
    %c0_95 = arith.constant 0 : index
    %261 = vector.load %arg12[%c0_94, %c0_95] : memref<8x128xf32, #tpu.memory_space<vmem>>, vector<8x128xf32>
    tpu.vector_store %arg12[%c0_94, %c0_95], %260 {strides = array<i32>} : memref<8x128xf32, #tpu.memory_space<vmem>>, vector<8x128xf32>,
    %c7_i32 = arith.constant 7 : i32
    %c8_i32_96 = arith.constant 8 : i32
    %262 = arith.muli %c7_i32, %c8_i32_96 : i32
    %263 = tpu.assume_multiple %262, 8 : i32
    %264 = arith.index_cast %263 : i32 to index
    %c0_97 = arith.constant 0 : index
    %265 = vector.load %arg11[%264, %c0_97] : memref<64x384xf32, #tpu.memory_space<vmem>>, vector<8x384xf32>
    %c0_98 = arith.constant 0 : index
    %c0_99 = arith.constant 0 : index
    %266 = vector.load %arg12[%c0_98, %c0_99] : memref<8x128xf32, #tpu.memory_space<vmem>>, vector<8x128xf32>
    %c0_100 = arith.constant 0 : index
    %c0_101 = arith.constant 0 : index
    %267 = vector.load %arg4[%c0_100, %c0_101] : memref<128x384xf32, #tpu.memory_space<vmem>>, vector<128x384xf32>
    %cst_102 = arith.constant dense<0.000000e+00> : vector<8x384xf32>
    %268 = tpu.matmul %266, %267, %cst_102 {dimension_numbers = #tpu.dot_dimension_numbers<[1], [0], [0], [1], [0, 0, 1, 1], [], []>} : vector<8x128xf32>, vector<128x384xf32>, vector<8x384xf32> -> vector<8x384xf32>
    %269 = vector.extract_strided_slice %265 {offsets = [0, 0], sizes = [8, 128], strides = [1, 1]} : vector<8x384xf32> to vector<8x128xf32>
    %270 = vector.extract_strided_slice %268 {offsets = [0, 0], sizes = [8, 128], strides = [1, 1]} : vector<8x384xf32> to vector<8x128xf32>
    %271 = arith.addf %269, %270 : vector<8x128xf32>
    %272 = arith.negf %271 : vector<8x128xf32>
    %273 = math.exp %272 : vector<8x128xf32>
    %cst_103 = arith.constant 1.000000e+00 : f32
    %274 = vector.broadcast %cst_103 : f32 to vector<8x128xf32>
    %275 = arith.addf %274, %273 : vector<8x128xf32>
    %276 = arith.divf %274, %275 : vector<8x128xf32>
    %277 = vector.extract_strided_slice %265 {offsets = [0, 128], sizes = [8, 128], strides = [1, 1]} : vector<8x384xf32> to vector<8x128xf32>
    %278 = vector.extract_strided_slice %268 {offsets = [0, 128], sizes = [8, 128], strides = [1, 1]} : vector<8x384xf32> to vector<8x128xf32>
    %279 = arith.addf %277, %278 : vector<8x128xf32>
    %280 = arith.negf %279 : vector<8x128xf32>
    %281 = math.exp %280 : vector<8x128xf32>
    %cst_104 = arith.constant 1.000000e+00 : f32
    %282 = vector.broadcast %cst_104 : f32 to vector<8x128xf32>
    %283 = arith.addf %282, %281 : vector<8x128xf32>
    %284 = arith.divf %282, %283 : vector<8x128xf32>
    %285 = vector.extract_strided_slice %265 {offsets = [0, 256], sizes = [8, 128], strides = [1, 1]} : vector<8x384xf32> to vector<8x128xf32>
    %286 = vector.extract_strided_slice %268 {offsets = [0, 256], sizes = [8, 128], strides = [1, 1]} : vector<8x384xf32> to vector<8x128xf32>
    %287 = vector.broadcast %9 : vector<1x128xf32> to vector<8x128xf32>
    %288 = arith.addf %286, %287 : vector<8x128xf32>
    %289 = arith.mulf %276, %288 : vector<8x128xf32>
    %290 = arith.addf %285, %289 : vector<8x128xf32>
    %291 = math.tanh %290 : vector<8x128xf32>
    %cst_105 = arith.constant 1.000000e+00 : f32
    %292 = vector.broadcast %cst_105 : f32 to vector<8x128xf32>
    %293 = arith.subf %292, %284 : vector<8x128xf32>
    %294 = arith.mulf %293, %291 : vector<8x128xf32>
    %295 = arith.mulf %284, %266 : vector<8x128xf32>
    %296 = arith.addf %294, %295 : vector<8x128xf32>
    %c0_106 = arith.constant 0 : index
    %c0_107 = arith.constant 0 : index
    %297 = vector.load %arg12[%c0_106, %c0_107] : memref<8x128xf32, #tpu.memory_space<vmem>>, vector<8x128xf32>
    tpu.vector_store %arg12[%c0_106, %c0_107], %296 {strides = array<i32>} : memref<8x128xf32, #tpu.memory_space<vmem>>, vector<8x128xf32>,
    %c8_i32_108 = arith.constant 8 : i32
    %c0_109 = arith.constant 0 : index
    %c0_110 = arith.constant 0 : index
    %298 = vector.load %arg12[%c0_109, %c0_110] : memref<8x128xf32, #tpu.memory_space<vmem>>, vector<8x128xf32>
    %c0_111 = arith.constant 0 : index
    %c0_112 = arith.constant 0 : index
    %299 = vector.load %arg10[%c0_111, %c0_112] : memref<8x128xf32, #tpu.memory_space<vmem>>, vector<8x128xf32>
    tpu.vector_store %arg10[%c0_111, %c0_112], %298 {strides = array<i32>} : memref<8x128xf32, #tpu.memory_space<vmem>>, vector<8x128xf32>,
    %c0_113 = arith.constant 0 : index
    %c0_114 = arith.constant 0 : index
    %300 = vector.load %arg7[%c0_113, %c0_114] : memref<128x128xf32, #tpu.memory_space<vmem>>, vector<128x128xf32>
    %cst_115 = arith.constant dense<0.000000e+00> : vector<8x128xf32>
    %301 = tpu.matmul %298, %300, %cst_115 {dimension_numbers = #tpu.dot_dimension_numbers<[1], [0], [0], [1], [0, 0, 1, 1], [], []>} : vector<8x128xf32>, vector<128x128xf32>, vector<8x128xf32> -> vector<8x128xf32>
    %c0_116 = arith.constant 0 : index
    %c0_117 = arith.constant 0 : index
    %302 = vector.load %arg8[%c0_116, %c0_117] : memref<1x128xf32, #tpu.memory_space<vmem>>, vector<1x128xf32>
    %303 = vector.broadcast %302 : vector<1x128xf32> to vector<8x128xf32>
    %304 = arith.addf %301, %303 : vector<8x128xf32>
    %c0_118 = arith.constant 0 : index
    %c0_119 = arith.constant 0 : index
    %305 = vector.load %arg9[%c0_118, %c0_119] : memref<8x128xf32, #tpu.memory_space<vmem>>, vector<8x128xf32>
    tpu.vector_store %arg9[%c0_118, %c0_119], %304 {strides = array<i32>} : memref<8x128xf32, #tpu.memory_space<vmem>>, vector<8x128xf32>,
    return
  }
  func.func @transform_0(%arg0: i32) -> (i32, i32) {
    %c0_i32 = arith.constant 0 : i32
    %c0_i32_0 = arith.constant 0 : i32
    %c0_i32_1 = arith.constant 0 : i32
    return %c0_i32, %c0_i32_0 : i32, i32
  }
  func.func @transform_1(%arg0: i32) -> (i32, i32) {
    %c0_i32 = arith.constant 0 : i32
    %c0_i32_0 = arith.constant 0 : i32
    %c0_i32_1 = arith.constant 0 : i32
    return %c0_i32, %c0_i32_0 : i32, i32
  }
  func.func @transform_2(%arg0: i32) -> (i32, i32) {
    %c0_i32 = arith.constant 0 : i32
    %c0_i32_0 = arith.constant 0 : i32
    %c0_i32_1 = arith.constant 0 : i32
    return %c0_i32, %c0_i32_0 : i32, i32
  }
  func.func @transform_3(%arg0: i32) -> (i32, i32) {
    %c0_i32 = arith.constant 0 : i32
    %c0_i32_0 = arith.constant 0 : i32
    %c0_i32_1 = arith.constant 0 : i32
    return %c0_i32, %c0_i32_0 : i32, i32
  }
  func.func @transform_4(%arg0: i32) -> (i32, i32) {
    %c0_i32 = arith.constant 0 : i32
    %c0_i32_0 = arith.constant 0 : i32
    %c0_i32_1 = arith.constant 0 : i32
    return %c0_i32, %c0_i32_0 : i32, i32
  }
  func.func @transform_5(%arg0: i32) -> (i32, i32) {
    %c0_i32 = arith.constant 0 : i32
    %c0_i32_0 = arith.constant 0 : i32
    %c0_i32_1 = arith.constant 0 : i32
    return %c0_i32, %c0_i32_0 : i32, i32
  }
  func.func @transform_6(%arg0: i32) -> (i32, i32) {
    %c0_i32 = arith.constant 0 : i32
    %c0_i32_0 = arith.constant 0 : i32
    %c0_i32_1 = arith.constant 0 : i32
    return %c0_i32, %c0_i32_0 : i32, i32
  }
  func.func @transform_7(%arg0: i32) -> (i32, i32) {
    %c0_i32 = arith.constant 0 : i32
    %c0_i32_0 = arith.constant 0 : i32
    %c0_i32_1 = arith.constant 0 : i32
    return %c0_i32, %c0_i32_0 : i32, i32
  }
  func.func @transform_8(%arg0: i32) -> (i32, i32) {
    %c0_i32 = arith.constant 0 : i32
    %c0_i32_0 = arith.constant 0 : i32
    %c0_i32_1 = arith.constant 0 : i32
    return %c0_i32, %c0_i32_0 : i32, i32
  }
  func.func @transform_9(%arg0: i32) -> (i32, i32) {
    %c0_i32 = arith.constant 0 : i32
    %c0_i32_0 = arith.constant 0 : i32
    %c0_i32_1 = arith.constant 0 : i32
    return %c0_i32, %c0_i32_0 : i32, i32
  }
}

</mosaic_0001>

<bundles_post_ra>
// kernel: tpu_custom_call.1
= control target key start
LH: loop header
LB: loop body
LE: loop exit
PB: predicated region body
PF: predicated region fallthrough
CT: control target
= control target key end

     0   :  { %15 = vsyncpa [#allocation5], 0  ;;  %s4330_s0 = inlined_call_operand.hbm [shape: f32[64,128], index: 0, kind: input, shape index: {}]   ;;  %s4331_s1 = inlined_call_operand.hbm [shape: f32[8,128], index: 1, kind: input, shape index: {}]   ;;  %s4332_s2 = inlined_call_operand.hbm [shape: f32[128,384], index: 2, kind: input, shape index: {}]   ;;  %s4333_s3 = inlined_call_operand.hbm [shape: f32[128,384], index: 3, kind: input, shape index: {}]   ;;  %s4334_s4 = inlined_call_operand.vmem [shape: f32[1,384], index: 4, kind: input, shape index: {}]   ;;  %s4335_s5 = inlined_call_operand.vmem [shape: f32[1,128], index: 5, kind: input, shape index: {}]   ;;  %s4336_s6 = inlined_call_operand.hbm [shape: f32[128,128], index: 6, kind: input, shape index: {}]   ;;  %s4337_s7 = inlined_call_operand.vmem [shape: f32[1,128], index: 7, kind: input, shape index: {}]   ;;  %s4338_s8 = inlined_call_operand.hbm [shape: f32[8,128], index: 8, kind: output, shape index: {0}]   ;;  %s4339_s9 = inlined_call_operand.hbm [shape: f32[8,128], index: 9, kind: output, shape index: {1}]  }
   0x1   :  { %16 = vsyncpa [#allocation8], 0 }
   0x2   :  { %17 = vsyncpa [#allocation11], 0 }
   0x3   :  { %18 = vsyncpa [#allocation6], 0 }
   0x4   :  { %19 = vsyncpa [#allocation15], 0  ;;  %s3690_s30 = smov [#allocation7]   ;;  %s3526_s13 = scalar_lea.hbm %s4331_s1, 128 }
   0x5   :  { %s38_s10 = sshll.u32 %s3690_s30, 4  ;;  %p3527_p0 = scmp.ne.s32.totalorder %s4331_s1, %s3526_s13  ;;  %s39_s10 = int_to_ptr.vmem [resolvable:$true] %s38_s10 }
   0x6   :  { %p3530_p1 = scmp.lt.u32.totalorder %s3526_s13, %s4331_s1 }
   0x8   :  { %p3532_p2 = pnand %p3530_p1, %p3527_p0 }
   0xa   :  { %3535 = shalt.err (!%p3532_p2)
}
   0xb   :  { %s3536_s18 = scalar_lea.vmem %s39_s10, 128  ;;  %p3541_p4 = scmp.lt.s32.totalorder %s39_s10, %s39_s10 }
   0xc   :  { %p3537_p3 = scmp.ne.s32.totalorder %s39_s10, %s3536_s18  ;;  %p3542_p5 = scmp.lt.s32.totalorder %s3536_s18, %s3536_s18 }
   0xe   :  { %p3543_p6 = por %p3542_p5, %p3541_p4 }
  0x10   :  { %p3544_p7 = pnand %p3543_p6, %p3537_p3 }
  0x12   :  { %3547 = shalt.err (!%p3544_p7)
}
  0x13   :  { %41 = dma.hbm_to_vmem [thread:$0]  %s4331_s1, 128, %s39_s10, [#allocation8]  }
  0x14   :  { %s3691_s21 = smov [#allocation10]   ;;  %s3692_s23 = smov [#allocation4]  }
  0x15   :  { %s59_s22 = sshll.u32 %s3691_s21, 4  ;;  %s25_s24 = sshll.u32 %s3692_s23, 4  ;;  %s60_s22 = int_to_ptr.vmem [resolvable:$true] %s59_s22  ;;  %s26_s24 = int_to_ptr.vmem [resolvable:$true] %s25_s24 }
  0x16   :  { %s3548_s27 = scalar_lea.hbm %s4333_s3, 6144 }
  0x17   :  { %p3549_p8 = scmp.ne.s32.totalorder %s4333_s3, %s3548_s27  ;;  %p3552_p9 = scmp.lt.u32.totalorder %s3548_s27, %s4333_s3 }
  0x19   :  { %p3554_p10 = pnand %p3552_p9, %p3549_p8 }
  0x1b   :  { %3557 = shalt.err (!%p3554_p10)
}
  0x1c   :  { %s3558_s1 = scalar_lea.vmem %s60_s22, 6144  ;;  %p3563_p12 = scmp.lt.s32.totalorder %s60_s22, %s60_s22 }
  0x1d   :  { %p3559_p11 = scmp.ne.s32.totalorder %s60_s22, %s3558_s1  ;;  %p3564_p13 = scmp.lt.s32.totalorder %s3558_s1, %s3558_s1 }
  0x1f   :  { %p3565_p0 = por %p3564_p13, %p3563_p12 }
  0x21   :  { %p3566_p1 = pnand %p3565_p0, %p3559_p11 }
  0x23   :  { %3569 = shalt.err (!%p3566_p1)
}
  0x24   :  { %s3693_s10 = smov 384   ;;  %s3694_s12 = smov 24  }
  0x25   :  { %65 = dma.hbm_to_vmem [thread:$0]  %s4333_s3, 6144, %s60_s22, [#allocation11], %s3693_s10, %s3693_s10, %s3694_s12  }
  0x26   :  { %s3570_s17 = scalar_lea.hbm %s4330_s0, 1024 }
  0x27   :  { %p3571_p2 = scmp.ne.s32.totalorder %s4330_s0, %s3570_s17  ;;  %p3574_p3 = scmp.lt.u32.totalorder %s3570_s17, %s4330_s0 }
  0x29   :  { %p3576_p4 = pnand %p3574_p3, %p3571_p2 }
  0x2b   :  { %3579 = shalt.err (!%p3576_p4)
}
  0x2c   :  { %s3580_s23 = scalar_lea.vmem %s26_s24, 1024  ;;  %p3585_p6 = scmp.lt.s32.totalorder %s26_s24, %s26_s24 }
  0x2d   :  { %p3581_p5 = scmp.ne.s32.totalorder %s26_s24, %s3580_s23  ;;  %p3586_p7 = scmp.lt.s32.totalorder %s3580_s23, %s3580_s23 }
  0x2f   :  { %p3587_p8 = por %p3586_p7, %p3585_p6 }
  0x31   :  { %p3588_p9 = pnand %p3587_p8, %p3581_p5 }
  0x33   :  { %3591 = shalt.err (!%p3588_p9)
}
  0x34   :  { %s3695_s3 = smov 128   ;;  %s3696_s22 = smov 8  }
  0x35   :  { %31 = dma.hbm_to_vmem [thread:$0]  %s4330_s0, 1024, %s26_s24, [#allocation5], %s3695_s3, %s3695_s3, %s3696_s22  }
  0x36   :  { %s3697_s27 = smov [#allocation9]   ;;  %s3698_s29 = smov [#allocation12]  }
  0x37   :  { %s47_s28 = sshll.u32 %s3697_s27, 4  ;;  %s75_s30 = sshll.u32 %s3698_s29, 4  ;;  %s48_s28 = int_to_ptr.vmem [resolvable:$true] %s47_s28  ;;  %s76_s30 = int_to_ptr.vmem [resolvable:$true] %s75_s30 }
  0x38   :  { %s3592_s13 = scalar_lea.hbm %s4332_s2, 6144 }
  0x39   :  { %p3593_p10 = scmp.ne.s32.totalorder %s4332_s2, %s3592_s13  ;;  %p3596_p11 = scmp.lt.u32.totalorder %s3592_s13, %s4332_s2 }
  0x3b   :  { %p3598_p12 = pnand %p3596_p11, %p3593_p10 }
  0x3d   :  { %3601 = shalt.err (!%p3598_p12)
}
  0x3e   :  { %s3602_s0 = scalar_lea.vmem %s48_s28, 6144  ;;  %p3607_p0 = scmp.lt.s32.totalorder %s48_s28, %s48_s28 }
  0x3f   :  { %p3603_p13 = scmp.ne.s32.totalorder %s48_s28, %s3602_s0  ;;  %p3608_p1 = scmp.lt.s32.totalorder %s3602_s0, %s3602_s0 }
  0x41   :  { %p3609_p2 = por %p3608_p1, %p3607_p0 }
  0x43   :  { %p3610_p3 = pnand %p3609_p2, %p3603_p13 }
  0x45   :  { %3613 = shalt.err (!%p3610_p3)
}
  0x46   :  { %53 = dma.hbm_to_vmem [thread:$0]  %s4332_s2, 6144, %s48_s28, [#allocation8], %s3693_s10, %s3693_s10, %s3694_s12  }
  0x47   :  { %s3614_s21 = scalar_lea.hbm %s4336_s6, 2048 }
  0x48   :  { %p3615_p4 = scmp.ne.s32.totalorder %s4336_s6, %s3614_s21  ;;  %p3618_p5 = scmp.lt.u32.totalorder %s3614_s21, %s4336_s6 }
  0x4a   :  { %p3620_p6 = pnand %p3618_p5, %p3615_p4 }
  0x4c   :  { %3623 = shalt.err (!%p3620_p6)
}
  0x4d   :  { %s3624_s29 = scalar_lea.vmem %s76_s30, 2048  ;;  %p3629_p8 = scmp.lt.s32.totalorder %s76_s30, %s76_s30 }
  0x4e   :  { %p3625_p7 = scmp.ne.s32.totalorder %s76_s30, %s3624_s29  ;;  %p3630_p9 = scmp.lt.s32.totalorder %s3624_s29, %s3624_s29 }
  0x50   :  { %p3631_p10 = por %p3630_p9, %p3629_p8 }
  0x52   :  { %p3632_p11 = pnand %p3631_p10, %p3625_p7 }
  0x54   :  { %3635 = shalt.err (!%p3632_p11)
}
  0x55   :  { %81 = dma.hbm_to_vmem [thread:$0]  %s4336_s6, 2048, %s76_s30, [#allocation11], %s3695_s3, %s3695_s3, %s3696_s22  }
  0x56   :  { %3680 = dma.done.wait [#allocation5], 1024  }
  0x57   :  { %3681 = vsyncadd [#allocation5], 4294966272 }
  0x58   :  { %3682 = dma.done.wait [#allocation8], 6272  }
  0x59   :  { %3683 = vsyncadd [#allocation8], 4294961024 }
  0x5a   :  { %3684 = dma.done.wait [#allocation11], 8192  }
  0x5b   :  { %3685 = vsyncadd [#allocation11], 4294959104  ;;  %v3699_v0 = vmov 0.0   ;;  %v108_v1 = vld [vmem:[#allocation9 + $0x8] sm:$0xff]  ;;  %v111_v2 = vld [vmem:[#allocation9 + $0x20] sm:$0xff]  ;;  %vm3701_vm0 = vmmov 0  }
  0x5c   :  { %236 = vmatprep.mubr.f32.mxu0 %v3699_v0  ;;  %v107_v3 = vld [vmem:[#allocation9] sm:$0xff]  ;;  %v2863_v4 = vpack.c.bf16 %v111_v2, %v108_v1  ;;  %v110_v5 = vld [vmem:[#allocation9 + $0x18] sm:$0xff]  ;;  %v117_v7 = vld [vmem:[#allocation9 + $0x50] sm:$0xff]  ;;  %s3702_s30 = smov [#allocation14]  }
  0x5d   :  { %v114_v6 = vld [vmem:[#allocation9 + $0x38] sm:$0xff]  ;;  %v2865_v8 = vpack.c.bf16 %v110_v5, %v107_v3  ;;  %v113_v10 = vld [vmem:[#allocation9 + $0x30] sm:$0xff]  ;;  %v116_v11 = vld [vmem:[#allocation9 + $0x48] sm:$0xff]  ;;  %s2287_s11 = sshll.u32 %s3702_s30, 4  ;;  %s2288_s11 = int_to_ptr.vmem [resolvable:$true] %s2287_s11 }
  0x5e   :  { %v2867_v9 = vpack.c.bf16 %v117_v7, %v114_v6  ;;  %v120_v12 = vld [vmem:[#allocation9 + $0x68] sm:$0xff]  ;;  %2864 = vmatprep.subr.bf16.mxu0 %v2863_v4  ;;  %v123_v13 = vld [vmem:[#allocation9 + $0x80] sm:$0xff]  ;;  %v2869_v14 = vpack.c.bf16 %v116_v11, %v113_v10  ;;  %v122_v17 = vld [vmem:[#allocation9 + $0x78] sm:$0xff]  ;;  %p3641_p13 = scmp.lt.s32.totalorder %s2288_s11, %s2288_s11 }
  0x5f   :  { %2866 = vmatpush1.bf16.msra.mxu0 %v2865_v8  ;;  %v2871_v15 = vpack.c.bf16 %v123_v13, %v120_v12  ;;  %v119_v16 = vld [vmem:[#allocation9 + $0x60] sm:$0xff]  ;;  %v126_v18 = vld [vmem:[#allocation9 + $0x98] sm:$0xff]  ;;  %v129_v19 = vld [vmem:[#allocation9 + $0xb0] sm:$0xff] }
  0x60   :  { %2868 = vmatprep.subr.bf16.mxu0 %v2867_v9  ;;  %v2873_v20 = vpack.c.bf16 %v122_v17, %v119_v16  ;;  %v125_v21 = vld [vmem:[#allocation9 + $0x90] sm:$0xff]  ;;  %v2875_v22 = vpack.c.bf16 %v129_v19, %v126_v18  ;;  %v128_v23 = vld [vmem:[#allocation9 + $0xa8] sm:$0xff]  ;;  %v135_v27 = vld [vmem:[#allocation9 + $0xe0] sm:$0xff] }
  0x61   :  { %v109_v24 = vld [vmem:[#allocation9 + $0x10] sm:$0xff]  ;;  %v112_v25 = vld [vmem:[#allocation9 + $0x28] sm:$0xff]  ;;  %v115_v29 = vld [vmem:[#allocation9 + $0x40] sm:$0xff]  ;;  %v2877_v31 = vpack.c.bf16 %v128_v23, %v125_v21 }
  0x62   :  { %v132_v26 = vld [vmem:[#allocation9 + $0xc8] sm:$0xff]  ;;  %v2895_v28 = vpack.c.bf16 %v112_v25, %v109_v24  ;;  %v118_v30 = vld [vmem:[#allocation9 + $0x58] sm:$0xff]  ;;  %v131_v32 = vld [vmem:[#allocation9 + $0xc0] sm:$0xff] }
  0x63   :  { %2870 = vmatpush1.bf16.msra.mxu0 %v2869_v14  ;;  %v2899_v33 = vpack.c.bf16 %v118_v30, %v115_v29  ;;  %v2879_v34 = vpack.c.bf16 %v135_v27, %v132_v26  ;;  %v134_v35 = vld [vmem:[#allocation9 + $0xd8] sm:$0xff]  ;;  %v121_v37 = vld [vmem:[#allocation9 + $0x70] sm:$0xff]  ;;  %v124_v40 = vld [vmem:[#allocation9 + $0x88] sm:$0xff] }
  0x64   :  { %2872 = vmatprep.subr.bf16.mxu0 %v2871_v15  ;;  %2896 = vmatprep.subr.bf16.mxu1 %v2895_v28  ;;  %v3827_v36 = vld [vmem:[#allocation4] sm:$0xff]  ;;  %v141_v39 = vld [vmem:[#allocation9 + $0x110] sm:$0xff]  ;;  %v2903_v41 = vpack.c.bf16 %v124_v40, %v121_v37  ;;  %v2881_v42 = vpack.c.bf16 %v134_v35, %v131_v32  ;;  %v127_v43 = vld [vmem:[#allocation9 + $0xa0] sm:$0xff]  ;;  %v3700_v40 = vmov 0.0|0.0  }
  0x65   :  { %2898 = vmatpush3.bf16.msra.mxu1 %v2895_v28  ;;  %v138_v38 = vld [vmem:[#allocation9 + $0xf8] sm:$0xff]  ;;  %2536 = vmatprep.mubr.f32.mxu1 %v3827_v36  ;;  %v137_v46 = vld [vmem:[#allocation9 + $0xf0] sm:$0xff]  ;;  %v140_v47 = vld [vmem:[#allocation9 + $0x108] sm:$0xff] }
  0x66   :  { %2900 = vmatprep.subr.bf16.mxu1 %v2899_v33  ;;  %v130_v44 = vld [vmem:[#allocation9 + $0xb8] sm:$0xff]  ;;  %v2883_v45 = vpack.c.bf16 %v141_v39, %v138_v38  ;;  %v144_v48 = vld [vmem:[#allocation9 + $0x128] sm:$0xff]  ;;  %v147_v49 = vld [vmem:[#allocation9 + $0x140] sm:$0xff]  ;;  %v2885_v53 = vpack.c.bf16 %v140_v47, %v137_v46 }
  0x67   :  { %2874 = vmatpush1.bf16.msra.mxu0 %v2873_v20  ;;  %v2907_v50 = vpack.c.bf16 %v130_v44, %v127_v43  ;;  %v133_v51 = vld [vmem:[#allocation9 + $0xd0] sm:$0xff]  ;;  %v136_v52 = vld [vmem:[#allocation9 + $0xe8] sm:$0xff]  ;;  %v2887_v54 = vpack.c.bf16 %v147_v49, %v144_v48  ;;  %v143_v55 = vld [vmem:[#allocation9 + $0x120] sm:$0xff] }
  0x68   :  { %2876 = vmatprep.subr.bf16.mxu0 %v2875_v22  ;;  %v146_v56 = vld [vmem:[#allocation9 + $0x138] sm:$0xff]  ;;  %v153_v58 = vld [vmem:[#allocation9 + $0x170] sm:$0xff]  ;;  %v2911_v59 = vpack.c.bf16 %v136_v52, %v133_v51  ;;  %v139_v60 = vld [vmem:[#allocation9 + $0x100] sm:$0xff] }
  0x69   :  { %2902 = vmatpush3.bf16.msra.mxu1 %v2899_v33  ;;  %v150_v57 = vld [vmem:[#allocation9 + $0x158] sm:$0xff]  ;;  %v2889_v62 = vpack.c.bf16 %v146_v56, %v143_v55  ;;  %v149_v1 = vld [vmem:[#allocation9 + $0x150] sm:$0xff]  ;;  %v152_v2 = vld [vmem:[#allocation9 + $0x168] sm:$0xff] }
  0x6a   :  { %2904 = vmatprep.subr.bf16.mxu1 %v2903_v41  ;;  %v142_v61 = vld [vmem:[#allocation9 + $0x118] sm:$0xff]  ;;  %v2891_v63 = vpack.c.bf16 %v153_v58, %v150_v57  ;;  %v425_v3 = vld [vmem:[#allocation10 + $0x8] sm:$0xff]  ;;  %v428_v4 = vld [vmem:[#allocation10 + $0x20] sm:$0xff]  ;;  %v2893_v8 = vpack.c.bf16 %v152_v2, %v149_v1 }
  0x6b   :  { %2878 = vmatpush1.bf16.msra.mxu0 %v2877_v31  ;;  %v2915_v5 = vpack.c.bf16 %v142_v61, %v139_v60  ;;  %v145_v6 = vld [vmem:[#allocation9 + $0x130] sm:$0xff]  ;;  %v148_v7 = vld [vmem:[#allocation9 + $0x148] sm:$0xff]  ;;  %v3830_v9 = vpack.c.bf16 %v428_v4, %v425_v3  ;;  %v424_v10 = vld [vmem:[#allocation10] sm:$0xff] }
  0x6c   :  { %2880 = vmatprep.subr.bf16.mxu0 %v2879_v34  ;;  %v427_v11 = vld [vmem:[#allocation10 + $0x18] sm:$0xff]  ;;  %v434_v13 = vld [vmem:[#allocation10 + $0x50] sm:$0xff]  ;;  %v2919_v14 = vpack.c.bf16 %v148_v7, %v145_v6  ;;  %v151_v15 = vld [vmem:[#allocation9 + $0x160] sm:$0xff] }
  0x6d   :  { %2906 = vmatpush3.bf16.msra.mxu1 %v2903_v41  ;;  %v431_v12 = vld [vmem:[#allocation10 + $0x38] sm:$0xff]  ;;  %v3832_v17 = vpack.c.bf16 %v427_v11, %v424_v10  ;;  %v430_v19 = vld [vmem:[#allocation10 + $0x30] sm:$0xff]  ;;  %v433_v20 = vld [vmem:[#allocation10 + $0x48] sm:$0xff] }
  0x6e   :  { %2908 = vmatprep.subr.bf16.mxu1 %v2907_v50  ;;  %v154_v16 = vld [vmem:[#allocation9 + $0x178] sm:$0xff]  ;;  %v3835_v18 = vpack.c.bf16 %v434_v13, %v431_v12  ;;  %v437_v21 = vld [vmem:[#allocation10 + $0x68] sm:$0xff]  ;;  %v440_v22 = vld [vmem:[#allocation10 + $0x80] sm:$0xff]  ;;  %v3840_v25 = vpack.c.bf16 %v433_v20, %v430_v19 }
  0x6f   :  { %2882 = vmatpush1.bf16.msra.mxu0 %v2881_v42  ;;  %v2923_v23 = vpack.c.bf16 %v154_v16, %v151_v15  ;;  %v100_v24 = vld [vmem:[#allocation4 + $0x8] sm:$0xff]  ;;  %v3843_v26 = vpack.c.bf16 %v440_v22, %v437_v21  ;;  %v439_v28 = vld [vmem:[#allocation10 + $0x78] sm:$0xff]  ;;  %v446_v30 = vld [vmem:[#allocation10 + $0xb0] sm:$0xff] }
  0x70   :  { %2884 = vmatprep.subr.bf16.mxu0 %v2883_v45  ;;  %v436_v27 = vld [vmem:[#allocation10 + $0x60] sm:$0xff]  ;;  %v443_v29 = vld [vmem:[#allocation10 + $0x98] sm:$0xff]  ;;  %v426_v31 = vld [vmem:[#allocation10 + $0x10] sm:$0xff] }
  0x71   :  { %2910 = vmatpush3.bf16.msra.mxu1 %v2907_v50  ;;  %v429_v32 = vld [vmem:[#allocation10 + $0x28] sm:$0xff]  ;;  %v3847_v34 = vpack.c.bf16 %v439_v28, %v436_v27  ;;  %v3850_v35 = vpack.c.bf16 %v446_v30, %v443_v29  ;;  %v452_v39 = vld [vmem:[#allocation10 + $0xe0] sm:$0xff]  ;;  %v435_v43 = vld [vmem:[#allocation10 + $0x58] sm:$0xff] }
  0x72   :  { %2912 = vmatprep.subr.bf16.mxu1 %v2911_v59  ;;  %v101_v33 = vld [vmem:[#allocation4 + $0x10] sm:$0xff]  ;;  %v3853_v41 = vpack.c.bf16 %v429_v32, %v426_v31  ;;  %v432_v42 = vld [vmem:[#allocation10 + $0x40] sm:$0xff]  ;;  %v102_v44 = vld [vmem:[#allocation4 + $0x18] sm:$0xff] }
  0x73   :  { %2886 = vmatpush1.bf16.msra.mxu0 %v2885_v53  ;;  %v445_v37 = vld [vmem:[#allocation10 + $0xa8] sm:$0xff]  ;;  %v448_v47 = vld [vmem:[#allocation10 + $0xc0] sm:$0xff]  ;;  %v451_v48 = vld [vmem:[#allocation10 + $0xd8] sm:$0xff]  ;;  %v3863_v51 = vpack.c.bf16 %v435_v43, %v432_v42 }
  0x74   :  { %2888 = vmatprep.subr.bf16.mxu0 %v2887_v54  ;;  %v449_v38 = vld [vmem:[#allocation10 + $0xc8] sm:$0xff]  ;;  %v455_v49 = vld [vmem:[#allocation10 + $0xf8] sm:$0xff]  ;;  %v458_v50 = vld [vmem:[#allocation10 + $0x110] sm:$0xff]  ;;  %v3868_v55 = vpack.c.bf16 %v451_v48, %v448_v47 }
  0x75   :  { %2914 = vmatpush3.bf16.msra.mxu1 %v2911_v59  ;;  %v3860_v46 = vpack.c.bf16 %v452_v39, %v449_v38  ;;  %v438_v52 = vld [vmem:[#allocation10 + $0x70] sm:$0xff]  ;;  %v441_v53 = vld [vmem:[#allocation10 + $0x88] sm:$0xff]  ;;  %v103_v54 = vld [vmem:[#allocation4 + $0x20] sm:$0xff]  ;;  %v3871_v56 = vpack.c.bf16 %v458_v50, %v455_v49 }
  0x76   :  { %2916 = vmatprep.subr.bf16.mxu1 %v2915_v5  ;;  %v454_v57 = vld [vmem:[#allocation10 + $0xf0] sm:$0xff]  ;;  %v457_v58 = vld [vmem:[#allocation10 + $0x108] sm:$0xff]  ;;  %v464_v60 = vld [vmem:[#allocation10 + $0x140] sm:$0xff]  ;;  %v3874_v61 = vpack.c.bf16 %v441_v53, %v438_v52 }
  0x77   :  { %2890 = vmatpush1.bf16.msra.mxu0 %v2889_v62  ;;  %v461_v59 = vld [vmem:[#allocation10 + $0x128] sm:$0xff]  ;;  %v444_v62 = vld [vmem:[#allocation10 + $0xa0] sm:$0xff]  ;;  %v3879_v2 = vpack.c.bf16 %v457_v58, %v454_v57  ;;  %v463_v6 = vld [vmem:[#allocation10 + $0x138] sm:$0xff] }
  0x78   :  { %2892 = vmatprep.subr.bf16.mxu0 %v2891_v63  ;;  %v447_v63 = vld [vmem:[#allocation10 + $0xb8] sm:$0xff]  ;;  %v104_v1 = vld [vmem:[#allocation4 + $0x28] sm:$0xff]  ;;  %v105_v3 = vld [vmem:[#allocation4 + $0x30] sm:$0xff]  ;;  %v3882_v4 = vpack.c.bf16 %v464_v60, %v461_v59 }
  0x79   :  { %2918 = vmatpush3.bf16.msra.mxu1 %v2915_v5  ;;  %v460_v5 = vld [vmem:[#allocation10 + $0x120] sm:$0xff]  ;;  %v467_v7 = vld [vmem:[#allocation10 + $0x158] sm:$0xff]  ;;  %v3885_v10 = vpack.c.bf16 %v447_v63, %v444_v62  ;;  %v450_v11 = vld [vmem:[#allocation10 + $0xd0] sm:$0xff] }
  0x7a   :  { %2920 = vmatprep.subr.bf16.mxu1 %v2919_v14  ;;  %v453_v12 = vld [vmem:[#allocation10 + $0xe8] sm:$0xff]  ;;  %v3890_v13 = vpack.c.bf16 %v463_v6, %v460_v5  ;;  %v466_v16 = vld [vmem:[#allocation10 + $0x150] sm:$0xff]  ;;  %v456_v21 = vld [vmem:[#allocation10 + $0x100] sm:$0xff] }
  0x7b   :  { %2894 = vmatpush1.bf16.msra.mxu0 %v2893_v8  ;;  %v470_v8 = vld [vmem:[#allocation10 + $0x170] sm:$0xff]  ;;  %v469_v19 = vld [vmem:[#allocation10 + $0x168] sm:$0xff]  ;;  %v3896_v20 = vpack.c.bf16 %v453_v12, %v450_v11  ;;  %v459_v22 = vld [vmem:[#allocation10 + $0x118] sm:$0xff] }
  0x7c   :  { %2928 = vmatprep.subr.bf16.mxu0 %v3830_v9  ;;  %v3893_v15 = vpack.c.bf16 %v470_v8, %v467_v7  ;;  %v462_v27 = vld [vmem:[#allocation10 + $0x130] sm:$0xff]  ;;  %v465_v28 = vld [vmem:[#allocation10 + $0x148] sm:$0xff]  ;;  %v3912_v29 = vld [vmem:[#allocation7] sm:$0xff] }
  0x7d   :  { %2922 = vmatpush3.bf16.msra.mxu1 %v2919_v14  ;;  %v106_v14 = vld [vmem:[#allocation4 + $0x38] sm:$0xff]  ;;  %v3916_v30 = vpack.c.bf16 %v465_v28, %v462_v27  ;;  %v468_v31 = vld [vmem:[#allocation10 + $0x160] sm:$0xff]  ;;  %v471_v32 = vld [vmem:[#allocation10 + $0x178] sm:$0xff] }
  0x7e   :  { %237 = vmatmul.mubr.f32.vlgmr.msra.gmra.mrb[0].mxu0 %v3827_v36  ;;  %2924 = vmatprep.subr.bf16.mxu1 %v2923_v23  ;;  %v442_v36 = vld [vmem:[#allocation10 + $0x90] sm:$0xff]  ;;  %v155_v39 = vld [vmem:[%s4334_s4] sm:$0x7] }
  0x7f   :  { %2930 = vmatpush1.bf16.msra.mxu0 %v3832_v17  ;;  %242 = vmatprep.mubr.f32.mxu0 %v3699_v0  ;;  %v3857_v45 = vpack.c.bf16 %v445_v37, %v442_v36  ;;  %v157_v36 = vlaneseq }
  0x80   :  { %2932 = vmatprep.subr.bf16.mxu0 %v3835_v18 }
  0x81   :  { %2926 = vmatpush3.bf16.msra.mxu1 %v2923_v23  ;;  %v3903_v23 = vpack.c.bf16 %v469_v19, %v466_v16  ;;  %v158_v37 = vshrl.u32 %v157_v36, 7 }
  0x82   :  { %243 = vmatmul.mubr.f32.gmra.mrb[2].mxu0 %v100_v24  ;;  %2959 = vmatprep.subr.bf16.mxu1 %v3700_v40 }
  0x83   :  { %2934 = vmatpush1.bf16.msra.mxu0 %v3840_v25  ;;  %248 = vmatprep.mubr.f32.mxu0 %v3699_v0  ;;  %v167_v38 = vsub.s32 2, %v158_v37 }
  0x84   :  { %2936 = vmatprep.subr.bf16.mxu0 %v3843_v26  ;;  %2537 = vmatmul.mubr.f32.vlgmr.msra.gmra.mrb[0].mxu1 %v100_v24  ;;  %v3907_v24 = vpack.c.bf16 %v459_v22, %v456_v21 }
  0x85   :  { %2961 = vmatpush3.bf16.msra.mxu1 %v3853_v41  ;;  %2539 = vmatprep.mubr.f32.mxu1 %v101_v33  ;;  %v168_v42 = vrot.slane %v155_v39, %v167_v38 }
  0x86   :  { %249 = vmatmul.mubr.f32.gmra.mrb[4].mxu0 %v101_v33  ;;  %2962 = vmatprep.subr.bf16.mxu1 %v3700_v40  ;;  %v3924_v33 = vpack.c.bf16 %v471_v32, %v468_v31  ;;  %v3988_v31 = vld [vmem:[%s4335_s5] ss:$0 sm:$0xff] }
  0x87   :  { %2938 = vmatpush1.bf16.msra.mxu0 %v3847_v34  ;;  %254 = vmatprep.mubr.f32.mxu0 %v3699_v0 }
  0x88   :  { %2940 = vmatprep.subr.bf16.mxu0 %v3850_v35  ;;  %2540 = vmatmul.mubr.f32.gmra.mrb[2].mxu1 %v102_v44 }
  0x89   :  { %2964 = vmatpush3.bf16.msra.mxu1 %v3863_v51  ;;  %2542 = vmatprep.mubr.f32.mxu1 %v103_v54 }
  0x8a   :  { %255 = vmatmul.mubr.f32.gmra.mrb[6].mxu0 %v102_v44  ;;  %2965 = vmatprep.subr.bf16.mxu1 %v3700_v40 }
  0x8b   :  { %2942 = vmatpush1.bf16.msra.mxu0 %v3857_v45  ;;  %260 = vmatprep.mubr.f32.mxu0 %v3699_v0 }
  0x8c   :  { %2944 = vmatprep.subr.bf16.mxu0 %v3860_v46  ;;  %2543 = vmatmul.mubr.f32.gmra.mrb[4].mxu1 %v104_v1 }
  0x8d   :  { %2967 = vmatpush3.bf16.msra.mxu1 %v3874_v61  ;;  %2545 = vmatprep.mubr.f32.mxu1 %v105_v3 }
  0x8e   :  { %261 = vmatmul.mubr.f32.gmra.mrb[8].mxu0 %v103_v54  ;;  %2968 = vmatprep.subr.bf16.mxu1 %v3700_v40 }
  0x8f   :  { %2946 = vmatpush1.bf16.msra.mxu0 %v3868_v55  ;;  %266 = vmatprep.mubr.f32.mxu0 %v3699_v0 }
  0x90   :  { %2948 = vmatprep.subr.bf16.mxu0 %v3871_v56  ;;  %2546 = vmatmul.mubr.f32.gmra.mrb[6].mxu1 %v106_v14 }
  0x91   :  { %2970 = vmatpush3.bf16.msra.mxu1 %v3885_v10  ;;  %2580 = vmatprep.mubr.msk.f32.mxu1 %vm3701_vm0, %v3699_v0 }
  0x92   :  { %267 = vmatmul.mubr.f32.gmra.mrb[10].mxu0 %v104_v1  ;;  %2971 = vmatprep.subr.bf16.mxu1 %v3700_v40  ;;  %v159_v1 = vsub.s32 0, %v158_v37 }
  0x93   :  { %2950 = vmatpush1.bf16.msra.mxu0 %v3879_v2  ;;  %272 = vmatprep.mubr.f32.mxu0 %v3699_v0 }
  0x94   :  { %2952 = vmatprep.subr.bf16.mxu0 %v3882_v4  ;;  %v3979_v5 = vrot.slane %v155_v39, %v159_v1 }
  0x95   :  { %2973 = vmatpush3.bf16.msra.mxu1 %v3896_v20 }
  0x96   :  { %273 = vmatmul.mubr.f32.gmra.mrb[12].mxu0 %v105_v3  ;;  %2974 = vmatprep.subr.bf16.mxu1 %v3700_v40  ;;  %v163_v3 = vsub.s32 1, %v158_v37 }
  0x97   :  { %2954 = vmatpush1.bf16.msra.mxu0 %v3890_v13  ;;  %278 = vmatprep.mubr.f32.mxu0 %v3699_v0 }
  0x98   :  { %2956 = vmatprep.subr.bf16.mxu0 %v3893_v15  ;;  %v3981_v7 = vrot.slane %v155_v39, %v163_v3 }
  0x99   :  { %2976 = vmatpush3.bf16.msra.mxu1 %v3907_v24 }
  0x9a   :  { %279 = vmatmul.mubr.f32.gmra.mrb[14].mxu0 %v106_v14  ;;  %2977 = vmatprep.subr.bf16.mxu1 %v3700_v40 }
  0x9b   :  { %2958 = vmatpush1.bf16.msra.mxu0 %v3903_v23  ;;  %536 = vmatprep.mubr.f32.mxu0 %v3699_v0 }
  0x9c   :  { %2984 = vmatprep.subr.bf16.mxu0 %v3830_v9 }
  0x9d   :  { %2979 = vmatpush3.bf16.msra.mxu1 %v3916_v30 }
  0x9e   :  { %537 = vmatmul.mubr.f32.vlgmr.msra.gmra.mrb[0].mxu0 %v3912_v29  ;;  %2980 = vmatprep.subr.bf16.mxu1 %v3700_v40 }
  0x9f   :  { %2986 = vmatpush1.bf16.msra.mxu0 %v3832_v17  ;;  %761 = vmatprep.mubr.f32.mxu0 %v3699_v0 }
  0xa0   :  { %2988 = vmatprep.subr.bf16.mxu0 %v3835_v18 }
  0xa1   :  { %2982 = vmatpush3.bf16.msra.mxu1 %v3924_v33 }
  0xa2   :  { %3015 = vmatprep.subr.bf16.mxu1 %v3700_v40 }
  0xa3   :  { %2990 = vmatpush1.bf16.msra.mxu0 %v3840_v25 }
  0xa4   :  { %2992 = vmatprep.subr.bf16.mxu0 %v3843_v26  ;;  %2581 = vmatmul.mubr.f32.vlgmr.msra.gmra.mrb[8].mxu1 %v3912_v29 }
  0xa5   :  { %3017 = vmatpush3.bf16.msra.mxu1 %v3853_v41  ;;  %2615 = vmatprep.mubr.msk.f32.mxu1 %vm3701_vm0, %v3699_v0 }
  0xa6   :  { %3018 = vmatprep.subr.bf16.mxu1 %v3700_v40 }
  0xa7   :  { %2994 = vmatpush1.bf16.msra.mxu0 %v3847_v34 }
  0xa8   :  { %2996 = vmatprep.subr.bf16.mxu0 %v3850_v35 }
  0xa9   :  { %3020 = vmatpush3.bf16.msra.mxu1 %v3863_v51 }
  0xaa   :  { %3021 = vmatprep.subr.bf16.mxu1 %v3700_v40 }
  0xab   :  { %2998 = vmatpush1.bf16.msra.mxu0 %v3857_v45 }
  0xac   :  { %3000 = vmatprep.subr.bf16.mxu0 %v3860_v46 }
  0xad   :  { %3023 = vmatpush3.bf16.msra.mxu1 %v3874_v61 }
  0xae   :  { %3024 = vmatprep.subr.bf16.mxu1 %v3700_v40 }
  0xaf   :  { %3002 = vmatpush1.bf16.msra.mxu0 %v3868_v55 }
  0xb0   :  { %3004 = vmatprep.subr.bf16.mxu0 %v3871_v56 }
  0xb1   :  { %3026 = vmatpush3.bf16.msra.mxu1 %v3885_v10 }
  0xb2   :  { %3027 = vmatprep.subr.bf16.mxu1 %v3700_v40 }
  0xb3   :  { %3006 = vmatpush1.bf16.msra.mxu0 %v3879_v2 }
  0xb4   :  { %3008 = vmatprep.subr.bf16.mxu0 %v3882_v4 }
  0xb5   :  { %3029 = vmatpush3.bf16.msra.mxu1 %v3896_v20 }
  0xb6   :  { %3030 = vmatprep.subr.bf16.mxu1 %v3700_v40 }
  0xb7   :  { %3010 = vmatpush1.bf16.msra.mxu0 %v3890_v13 }
  0xb8   :  { %3012 = vmatprep.subr.bf16.mxu0 %v3893_v15 }
  0xb9   :  { %3032 = vmatpush3.bf16.msra.mxu1 %v3907_v24 }
  0xba   :  { %3033 = vmatprep.subr.bf16.mxu1 %v3700_v40 }
  0xbb   :  { %3014 = vmatpush1.bf16.msra.mxu0 %v3903_v23 }
  0xbc   :  { %3040 = vmatprep.subr.bf16.mxu0 %v3830_v9 }
  0xbd   :  { %3035 = vmatpush3.bf16.msra.mxu1 %v3916_v30 }
  0xbe   :  { %3036 = vmatprep.subr.bf16.mxu1 %v3700_v40 }
  0xc1   :  { %3038 = vmatpush3.bf16.msra.mxu1 %v3924_v33 }
  0xc2   :  { %3071 = vmatprep.subr.bf16.mxu1 %v3700_v40 }
 0x157   :  { %v2538_v43 = vpop.f32.mrb[0].mxu1 }
 0x158   :  { %v3965_v44 = vadd.f32 %v2538_v43, %v168_v42  ;;  %v351_v47 = vpop.f32.mrb[1].mxu1 }
 0x159   :  { %v352_v38 = vadd.f32 %v351_v47, %v168_v42 }
 0x15b   :  { %v2541_v48 = vpop.f32.mrb[2].mxu1 }
 0x15c   :  { %v3967_v49 = vadd.f32 %v2541_v48, %v168_v42  ;;  %v361_v50 = vpop.f32.mrb[3].mxu1 }
 0x15d   :  { %v3969_v52 = vadd.f32 %v361_v50, %v168_v42 }
 0x15f   :  { %v2544_v53 = vpop.f32.mrb[4].mxu1 }
 0x160   :  { %v3971_v54 = vadd.f32 %v2544_v53, %v168_v42  ;;  %v371_v57 = vpop.f32.mrb[5].mxu1 }
 0x161   :  { %v3973_v58 = vadd.f32 %v371_v57, %v168_v42 }
 0x163   :  { %v2547_v59 = vpop.f32.mrb[6].mxu1 }
 0x164   :  { %v3975_v60 = vadd.f32 %v2547_v59, %v168_v42  ;;  %v381_v62 = vpop.f32.mrb[7].mxu1 }
 0x165   :  { %v3977_v63 = vadd.f32 %v381_v62, %v168_v42 }
 0x171   :  { %v538_v6 = vpop.f32.mrb[0].mxu0 }
 0x172   :  { %v3399_v8 = vadd.f32 %v538_v6, %v3979_v5  ;;  %v540_v11 = vpop.f32.mrb[1].mxu0 }
 0x173   :  { %v3400_v14 = vadd.f32 %v540_v11, %v3981_v7 }
 0x174   :  { %v2309_v12 = vmul.f32 -1.442695, %v3399_v8 }
 0x175   :  { %v2310_v16 = vmul.f32 -1.442695, %v3400_v14 }
 0x176   :  { %3445 = vpow2.f32 %v2309_v12 }
 0x177   :  { %v609_v19 = vpop.f32.mrb[8].mxu1  ;;  %3447 = vpow2.f32 %v2310_v16 }
 0x178   :  { %v2582_v21 = vpop.f32.mrb[9].mxu1  ;;  %v633_v36 = vadd.f32 %v3988_v31, %v609_v19 }
 0x180   :  { %v3446_v22 = vpop.eup %3445 }
 0x181   :  { %v617_v27 = vadd.f32 1.0, %v3446_v22  ;;  %v3448_v28 = vpop.eup %3447 }
 0x182   :  { %v624_v32 = vadd.f32 1.0, %v3448_v28 }
 0x183   :  { %3449 = vrcp.f32 %v617_v27 }
 0x184   :  { %3451 = vrcp.f32 %v624_v32 }
 0x18d   :  { %v3450_v37 = vpop.eup %3449 }
 0x18e   :  { %v634_v39 = vmul.f32 %v3450_v37, %v633_v36  ;;  %v3452_v48 = vpop.eup %3451 }
 0x18f   :  { %v637_v50 = vsub.f32 1.0, %v3452_v48  ;;  %v639_v59 = vmul.f32 %v3452_v48, %v3912_v29  ;;  %v1310_v48 = vld [vmem:[#allocation10 + $0x20] sm:$0xff] }
 0x190   :  { %v635_v43 = vadd.f32 %v634_v39, %v352_v38 }
 0x192   :  { %3453 = vtanh.f32 %v635_v43 }
 0x19c   :  { %v3454_v53 = vpop.eup %3453 }
 0x19d   :  { %v638_v57 = vmul.f32 %v3454_v53, %v637_v50  ;;  %v1309_v53 = vld [vmem:[#allocation10 + $0x18] sm:$0xff] }
 0x19f   :  { %v640_v62 = vadd.f32 %v639_v59, %v638_v57  ;;  %v1313_v59 = vld [vmem:[#allocation10 + $0x38] sm:$0xff] }
 0x1a1   :  { %762 = vmatmul.mubr.f32.vlgmr.msra.gmra.mrb[2].mxu0 %v640_v62  ;;  %2616 = vmatmul.mubr.f32.vlgmr.msra.gmra.mrb[10].mxu1 %v640_v62 }
 0x1a2   :  { %3042 = vmatpush1.bf16.msra.mxu0 %v3832_v17  ;;  %3073 = vmatpush3.bf16.msra.mxu1 %v3853_v41 }
 0x1a3   :  { %3044 = vmatprep.subr.bf16.mxu0 %v3835_v18  ;;  %3074 = vmatprep.subr.bf16.mxu1 %v3700_v40 }
 0x1a4   :  { %980 = vmatprep.mubr.f32.mxu0 %v3699_v0  ;;  %2650 = vmatprep.mubr.msk.f32.mxu1 %vm3701_vm0, %v3699_v0 }
 0x1a6   :  { %3046 = vmatpush1.bf16.msra.mxu0 %v3840_v25  ;;  %3076 = vmatpush3.bf16.msra.mxu1 %v3863_v51 }
 0x1a7   :  { %3048 = vmatprep.subr.bf16.mxu0 %v3843_v26  ;;  %3077 = vmatprep.subr.bf16.mxu1 %v3700_v40 }
 0x1aa   :  { %3050 = vmatpush1.bf16.msra.mxu0 %v3847_v34  ;;  %3079 = vmatpush3.bf16.msra.mxu1 %v3874_v61 }
 0x1ab   :  { %3052 = vmatprep.subr.bf16.mxu0 %v3850_v35  ;;  %3080 = vmatprep.subr.bf16.mxu1 %v3700_v40 }
 0x1ae   :  { %3054 = vmatpush1.bf16.msra.mxu0 %v3857_v45  ;;  %3082 = vmatpush3.bf16.msra.mxu1 %v3885_v10 }
 0x1af   :  { %3056 = vmatprep.subr.bf16.mxu0 %v3860_v46  ;;  %3083 = vmatprep.subr.bf16.mxu1 %v3700_v40 }
 0x1b2   :  { %3058 = vmatpush1.bf16.msra.mxu0 %v3868_v55  ;;  %3085 = vmatpush3.bf16.msra.mxu1 %v3896_v20 }
 0x1b3   :  { %3060 = vmatprep.subr.bf16.mxu0 %v3871_v56  ;;  %3086 = vmatprep.subr.bf16.mxu1 %v3700_v40 }
 0x1b6   :  { %3062 = vmatpush1.bf16.msra.mxu0 %v3879_v2  ;;  %3088 = vmatpush3.bf16.msra.mxu1 %v3907_v24 }
 0x1b7   :  { %3064 = vmatprep.subr.bf16.mxu0 %v3882_v4  ;;  %3089 = vmatprep.subr.bf16.mxu1 %v3700_v40 }
 0x1ba   :  { %3066 = vmatpush1.bf16.msra.mxu0 %v3890_v13  ;;  %3091 = vmatpush3.bf16.msra.mxu1 %v3916_v30 }
 0x1bb   :  { %3068 = vmatprep.subr.bf16.mxu0 %v3893_v15  ;;  %3092 = vmatprep.subr.bf16.mxu1 %v3700_v40 }
 0x1be   :  { %3070 = vmatpush1.bf16.msra.mxu0 %v3903_v23  ;;  %3094 = vmatpush3.bf16.msra.mxu1 %v3924_v33 }
 0x1bf   :  { %3096 = vmatprep.subr.bf16.mxu0 %v3830_v9  ;;  %3127 = vmatprep.subr.bf16.mxu1 %v3700_v40 }
 0x274   :  { %v763_v29 = vpop.f32.mrb[2].mxu0  ;;  %v834_v42 = vpop.f32.mrb[10].mxu1 }
 0x275   :  { %v3401_v47 = vadd.f32 %v763_v29, %v3979_v5  ;;  %v765_v1 = vpop.f32.mrb[3].mxu0  ;;  %v2617_v3 = vpop.f32.mrb[11].mxu1  ;;  %v852_v9 = vadd.f32 %v3988_v31, %v834_v42  ;;  %v1312_v29 = vld [vmem:[#allocation10 + $0x30] sm:$0xff] }
 0x276   :  { %v3402_v8 = vadd.f32 %v765_v1, %v3981_v7  ;;  %v1322_v1 = vld [vmem:[#allocation10 + $0x80] sm:$0xff] }
 0x277   :  { %v2312_v6 = vmul.f32 -1.442695, %v3401_v47  ;;  %v1319_v47 = vld [vmem:[#allocation10 + $0x68] sm:$0xff] }
 0x278   :  { %v2313_v11 = vmul.f32 -1.442695, %v3402_v8  ;;  %v4094_v3 = vpack.c.bf16 %v1322_v1, %v1319_v47  ;;  %v1321_v8 = vld [vmem:[#allocation10 + $0x78] sm:$0xff] }
 0x279   :  { %3455 = vpow2.f32 %v2312_v6  ;;  %v1318_v6 = vld [vmem:[#allocation10 + $0x60] sm:$0xff] }
 0x27a   :  { %3457 = vpow2.f32 %v2313_v11  ;;  %v4096_v11 = vpack.c.bf16 %v1321_v8, %v1318_v6 }
 0x283   :  { %v3456_v12 = vpop.eup %3455 }
 0x284   :  { %v842_v14 = vadd.f32 1.0, %v3456_v12  ;;  %v3458_v16 = vpop.eup %3457  ;;  %v1325_v12 = vld [vmem:[#allocation10 + $0x98] sm:$0xff] }
 0x285   :  { %v849_v19 = vadd.f32 1.0, %v3458_v16 }
 0x286   :  { %3459 = vrcp.f32 %v842_v14  ;;  %v1328_v14 = vld [vmem:[#allocation10 + $0xb0] sm:$0xff] }
 0x287   :  { %3461 = vrcp.f32 %v849_v19  ;;  %v4100_v16 = vpack.c.bf16 %v1328_v14, %v1325_v12  ;;  %v1324_v19 = vld [vmem:[#allocation10 + $0x90] sm:$0xff] }
 0x290   :  { %v3460_v21 = vpop.eup %3459 }
 0x291   :  { %v853_v22 = vmul.f32 %v3460_v21, %v852_v9  ;;  %v3462_v28 = vpop.eup %3461  ;;  %v1327_v9 = vld [vmem:[#allocation10 + $0xa8] sm:$0xff]  ;;  %v1326_v21 = vld [vmem:[#allocation10 + $0xa0] sm:$0xff] }
 0x292   :  { %v856_v32 = vsub.f32 1.0, %v3462_v28  ;;  %v858_v38 = vmul.f32 %v3462_v28, %v640_v62 }
 0x293   :  { %v854_v27 = vadd.f32 %v853_v22, %v3965_v44  ;;  %v4102_v22 = vpack.c.bf16 %v1327_v9, %v1324_v19 }
 0x295   :  { %3463 = vtanh.f32 %v854_v27  ;;  %v1329_v27 = vld [vmem:[#allocation10 + $0xb8] sm:$0xff] }
 0x296   :  { %v4105_v28 = vpack.c.bf16 %v1329_v27, %v1326_v21 }
 0x29f   :  { %v3464_v36 = vpop.eup %3463 }
 0x2a0   :  { %v857_v37 = vmul.f32 %v3464_v36, %v856_v32  ;;  %v1331_v32 = vld [vmem:[#allocation10 + $0xc8] sm:$0xff]  ;;  %v1334_v36 = vld [vmem:[#allocation10 + $0xe0] sm:$0xff] }
 0x2a2   :  { %v859_v39 = vadd.f32 %v858_v38, %v857_v37  ;;  %v4109_v37 = vpack.c.bf16 %v1334_v36, %v1331_v32  ;;  %v1330_v38 = vld [vmem:[#allocation10 + $0xc0] sm:$0xff] }
 0x2a4   :  { %981 = vmatmul.mubr.f32.vlgmr.msra.gmra.mrb[4].mxu0 %v859_v39  ;;  %2651 = vmatmul.mubr.f32.vlgmr.msra.gmra.mrb[12].mxu1 %v859_v39 }
 0x2a5   :  { %3098 = vmatpush1.bf16.msra.mxu0 %v3832_v17  ;;  %3129 = vmatpush3.bf16.msra.mxu1 %v3853_v41 }
 0x2a6   :  { %3100 = vmatprep.subr.bf16.mxu0 %v3835_v18  ;;  %3130 = vmatprep.subr.bf16.mxu1 %v3700_v40 }
 0x2a7   :  { %1199 = vmatprep.mubr.f32.mxu0 %v3699_v0  ;;  %2685 = vmatprep.mubr.msk.f32.mxu1 %vm3701_vm0, %v3699_v0 }
 0x2a9   :  { %3102 = vmatpush1.bf16.msra.mxu0 %v3840_v25  ;;  %3132 = vmatpush3.bf16.msra.mxu1 %v3863_v51 }
 0x2aa   :  { %3104 = vmatprep.subr.bf16.mxu0 %v3843_v26  ;;  %3133 = vmatprep.subr.bf16.mxu1 %v3700_v40 }
 0x2ad   :  { %3106 = vmatpush1.bf16.msra.mxu0 %v3847_v34  ;;  %3135 = vmatpush3.bf16.msra.mxu1 %v3874_v61 }
 0x2ae   :  { %3108 = vmatprep.subr.bf16.mxu0 %v3850_v35  ;;  %3136 = vmatprep.subr.bf16.mxu1 %v3700_v40 }
 0x2b1   :  { %3110 = vmatpush1.bf16.msra.mxu0 %v3857_v45  ;;  %3138 = vmatpush3.bf16.msra.mxu1 %v3885_v10 }
 0x2b2   :  { %3112 = vmatprep.subr.bf16.mxu0 %v3860_v46  ;;  %3139 = vmatprep.subr.bf16.mxu1 %v3700_v40 }
 0x2b5   :  { %3114 = vmatpush1.bf16.msra.mxu0 %v3868_v55  ;;  %3141 = vmatpush3.bf16.msra.mxu1 %v3896_v20 }
 0x2b6   :  { %3116 = vmatprep.subr.bf16.mxu0 %v3871_v56  ;;  %3142 = vmatprep.subr.bf16.mxu1 %v3700_v40 }
 0x2b9   :  { %3118 = vmatpush1.bf16.msra.mxu0 %v3879_v2  ;;  %3144 = vmatpush3.bf16.msra.mxu1 %v3907_v24 }
 0x2ba   :  { %3120 = vmatprep.subr.bf16.mxu0 %v3882_v4  ;;  %3145 = vmatprep.subr.bf16.mxu1 %v3700_v40 }
 0x2bd   :  { %3122 = vmatpush1.bf16.msra.mxu0 %v3890_v13  ;;  %3147 = vmatpush3.bf16.msra.mxu1 %v3916_v30 }
 0x2be   :  { %3124 = vmatprep.subr.bf16.mxu0 %v3893_v15  ;;  %3148 = vmatprep.subr.bf16.mxu1 %v3700_v40 }
 0x2c1   :  { %3126 = vmatpush1.bf16.msra.mxu0 %v3903_v23  ;;  %3150 = vmatpush3.bf16.msra.mxu1 %v3924_v33 }
 0x2c2   :  { %3183 = vmatprep.subr.bf16.mxu1 %v3700_v40 }
 0x377   :  { %v982_v17 = vpop.f32.mrb[4].mxu0  ;;  %v1053_v18 = vpop.f32.mrb[12].mxu1 }
 0x378   :  { %v3403_v25 = vadd.f32 %v982_v17, %v3979_v5  ;;  %v984_v26 = vpop.f32.mrb[5].mxu0  ;;  %v2652_v34 = vpop.f32.mrb[13].mxu1  ;;  %v1071_v10 = vadd.f32 %v3988_v31, %v1053_v18  ;;  %v1332_v17 = vld [vmem:[#allocation10 + $0xd0] sm:$0xff] }
 0x379   :  { %v3404_v45 = vadd.f32 %v984_v26, %v3981_v7  ;;  %v1337_v34 = vld [vmem:[#allocation10 + $0xf8] sm:$0xff] }
 0x37a   :  { %v2314_v35 = vmul.f32 -1.442695, %v3403_v25  ;;  %v1335_v25 = vld [vmem:[#allocation10 + $0xe8] sm:$0xff] }
 0x37b   :  { %v2315_v46 = vmul.f32 -1.442695, %v3404_v45  ;;  %v4115_v26 = vpack.c.bf16 %v1335_v25, %v1332_v17  ;;  %v1336_v45 = vld [vmem:[#allocation10 + $0xf0] sm:$0xff] }
 0x37c   :  { %3465 = vpow2.f32 %v2314_v35  ;;  %v1340_v35 = vld [vmem:[#allocation10 + $0x110] sm:$0xff] }
 0x37d   :  { %3467 = vpow2.f32 %v2315_v46  ;;  %v4119_v46 = vpack.c.bf16 %v1340_v35, %v1337_v34 }
 0x386   :  { %v3466_v55 = vpop.eup %3465 }
 0x387   :  { %v1061_v56 = vadd.f32 1.0, %v3466_v55  ;;  %v3468_v2 = vpop.eup %3467  ;;  %v1339_v55 = vld [vmem:[#allocation10 + $0x108] sm:$0xff] }
 0x388   :  { %v1068_v4 = vadd.f32 1.0, %v3468_v2  ;;  %v1341_v2 = vld [vmem:[#allocation10 + $0x118] sm:$0xff] }
 0x389   :  { %3469 = vrcp.f32 %v1061_v56  ;;  %v1338_v56 = vld [vmem:[#allocation10 + $0x100] sm:$0xff] }
 0x38a   :  { %3471 = vrcp.f32 %v1068_v4  ;;  %v4122_v4 = vpack.c.bf16 %v1339_v55, %v1336_v45 }
 0x393   :  { %v3470_v13 = vpop.eup %3469 }
 0x394   :  { %v1072_v15 = vmul.f32 %v3470_v13, %v1071_v10  ;;  %v3472_v23 = vpop.eup %3471  ;;  %v4124_v10 = vpack.c.bf16 %v1341_v2, %v1338_v56  ;;  %v1343_v13 = vld [vmem:[#allocation10 + $0x128] sm:$0xff] }
 0x395   :  { %v1075_v24 = vsub.f32 1.0, %v3472_v23  ;;  %v1077_v44 = vmul.f32 %v3472_v23, %v859_v39  ;;  %v1333_v39 = vld [vmem:[#allocation10 + $0xd8] sm:$0xff] }
 0x396   :  { %v1073_v20 = vadd.f32 %v1072_v15, %v3969_v52  ;;  %v1307_v52 = vld [vmem:[#allocation10 + $0x8] sm:$0xff]  ;;  %v4112_v18 = vpack.c.bf16 %v1333_v39, %v1330_v38  ;;  %v1346_v15 = vld [vmem:[#allocation10 + $0x140] sm:$0xff] }
 0x397   :  { %v4082_v50 = vpack.c.bf16 %v1310_v48, %v1307_v52  ;;  %v4127_v23 = vpack.c.bf16 %v1346_v15, %v1343_v13  ;;  %v1349_v52 = vld [vmem:[#allocation10 + $0x158] sm:$0xff]  ;;  %v1352_v48 = vld [vmem:[#allocation10 + $0x170] sm:$0xff] }
 0x398   :  { %3473 = vtanh.f32 %v1073_v20  ;;  %v1342_v20 = vld [vmem:[#allocation10 + $0x120] sm:$0xff] }
 0x399   :  { %3152 = vmatprep.subr.bf16.mxu0 %v4082_v50 }
 0x3a2   :  { %v3474_v30 = vpop.eup %3473 }
 0x3a3   :  { %v1076_v33 = vmul.f32 %v3474_v30, %v1075_v24  ;;  %v1345_v24 = vld [vmem:[#allocation10 + $0x138] sm:$0xff]  ;;  %v1344_v30 = vld [vmem:[#allocation10 + $0x130] sm:$0xff] }
 0x3a5   :  { %v4069_v43 = vadd.f32 %v1077_v44, %v1076_v33  ;;  %v1347_v33 = vld [vmem:[#allocation10 + $0x148] sm:$0xff]  ;;  %v4130_v44 = vpack.c.bf16 %v1345_v24, %v1342_v20  ;;  %v1533_v24 = vld [vmem:[#allocation10 + $0x40] sm:$0xff] }
 0x3a7   :  { %1200 = vmatmul.mubr.f32.vlgmr.msra.gmra.mrb[6].mxu0 %v4069_v43  ;;  %2686 = vmatmul.mubr.f32.vlgmr.msra.gmra.mrb[14].mxu1 %v4069_v43 }
 0x3a8   :  { %3185 = vmatpush3.bf16.msra.mxu1 %v3853_v41  ;;  %1418 = vmatprep.mubr.f32.mxu0 %v3699_v0  ;;  %v1306_v41 = vld [vmem:[#allocation10] sm:$0xff] }
 0x3a9   :  { %3186 = vmatprep.subr.bf16.mxu1 %v3700_v40  ;;  %2720 = vmatprep.mubr.msk.f32.mxu1 %vm3701_vm0, %v3699_v0  ;;  %v4084_v57 = vpack.c.bf16 %v1309_v53, %v1306_v41  ;;  %v4134_v41 = vpack.c.bf16 %v1347_v33, %v1344_v30  ;;  %v4136_v53 = vpack.c.bf16 %v1352_v48, %v1349_v52  ;;  %v1536_v30 = vld [vmem:[#allocation10 + $0x58] sm:$0xff]  ;;  %v1539_v52 = vld [vmem:[#allocation10 + $0x70] sm:$0xff]  ;;  %v1542_v48 = vld [vmem:[#allocation10 + $0x88] sm:$0xff] }
 0x3aa   :  { %v4183_v33 = vpack.c.bf16 %v1536_v30, %v1533_v24 }
 0x3ab   :  { %3154 = vmatpush1.bf16.msra.mxu0 %v4084_v57 }
 0x3ac   :  { %3188 = vmatpush3.bf16.msra.mxu1 %v3863_v51  ;;  %v1316_v51 = vld [vmem:[#allocation10 + $0x50] sm:$0xff] }
 0x3ad   :  { %3189 = vmatprep.subr.bf16.mxu1 %v3700_v40  ;;  %v4088_v62 = vpack.c.bf16 %v1316_v51, %v1313_v59  ;;  %v1348_v59 = vld [vmem:[#allocation10 + $0x150] sm:$0xff]  ;;  %v1351_v51 = vld [vmem:[#allocation10 + $0x168] sm:$0xff] }
 0x3ae   :  { %v4140_v47 = vpack.c.bf16 %v1351_v51, %v1348_v59  ;;  %v4187_v59 = vpack.c.bf16 %v1542_v48, %v1539_v52 }
 0x3af   :  { %3156 = vmatprep.subr.bf16.mxu0 %v4088_v62 }
 0x3b0   :  { %3191 = vmatpush3.bf16.msra.mxu1 %v3874_v61  ;;  %v1315_v61 = vld [vmem:[#allocation10 + $0x48] sm:$0xff] }
 0x3b1   :  { %3192 = vmatprep.subr.bf16.mxu1 %v3700_v40  ;;  %v4090_v42 = vpack.c.bf16 %v1315_v61, %v1312_v29  ;;  %v1350_v29 = vld [vmem:[#allocation10 + $0x160] sm:$0xff]  ;;  %v1353_v61 = vld [vmem:[#allocation10 + $0x178] sm:$0xff] }
 0x3b2   :  { %v4144_v1 = vpack.c.bf16 %v1353_v61, %v1350_v29 }
 0x3b3   :  { %3158 = vmatpush1.bf16.msra.mxu0 %v4090_v42 }
 0x3b4   :  { %3160 = vmatprep.subr.bf16.mxu0 %v4094_v3  ;;  %3194 = vmatpush3.bf16.msra.mxu1 %v4105_v28 }
 0x3b5   :  { %3195 = vmatprep.subr.bf16.mxu1 %v3700_v40 }
 0x3b7   :  { %3162 = vmatpush1.bf16.msra.mxu0 %v4096_v11 }
 0x3b8   :  { %3164 = vmatprep.subr.bf16.mxu0 %v4100_v16  ;;  %3197 = vmatpush3.bf16.msra.mxu1 %v4115_v26 }
 0x3b9   :  { %3198 = vmatprep.subr.bf16.mxu1 %v3700_v40 }
 0x3bb   :  { %3166 = vmatpush1.bf16.msra.mxu0 %v4102_v22 }
 0x3bc   :  { %3168 = vmatprep.subr.bf16.mxu0 %v4109_v37  ;;  %3200 = vmatpush3.bf16.msra.mxu1 %v4124_v10 }
 0x3bd   :  { %3201 = vmatprep.subr.bf16.mxu1 %v3700_v40 }
 0x3bf   :  { %3170 = vmatpush1.bf16.msra.mxu0 %v4112_v18 }
 0x3c0   :  { %3172 = vmatprep.subr.bf16.mxu0 %v4119_v46  ;;  %3203 = vmatpush3.bf16.msra.mxu1 %v4134_v41 }
 0x3c1   :  { %3204 = vmatprep.subr.bf16.mxu1 %v3700_v40 }
 0x3c3   :  { %3174 = vmatpush1.bf16.msra.mxu0 %v4122_v4 }
 0x3c4   :  { %3176 = vmatprep.subr.bf16.mxu0 %v4127_v23  ;;  %3206 = vmatpush3.bf16.msra.mxu1 %v4144_v1 }
 0x3c5   :  { %3239 = vmatprep.subr.bf16.mxu1 %v3700_v40 }
 0x3c7   :  { %3178 = vmatpush1.bf16.msra.mxu0 %v4130_v44 }
 0x3c8   :  { %3180 = vmatprep.subr.bf16.mxu0 %v4136_v53 }
 0x3cb   :  { %3182 = vmatpush1.bf16.msra.mxu0 %v4140_v47 }
 0x3cc   :  { %3208 = vmatprep.subr.bf16.mxu0 %v4082_v50 }
 0x47a   :  { %v1201_v6 = vpop.f32.mrb[6].mxu0  ;;  %v1272_v8 = vpop.f32.mrb[14].mxu1 }
 0x47b   :  { %v3405_v12 = vadd.f32 %v1201_v6, %v3979_v5  ;;  %v1203_v14 = vpop.f32.mrb[7].mxu0  ;;  %v2687_v19 = vpop.f32.mrb[15].mxu1  ;;  %v1290_v17 = vadd.f32 %v3988_v31, %v1272_v8 }
 0x47c   :  { %v3406_v21 = vadd.f32 %v1203_v14, %v3981_v7 }
 0x47d   :  { %v2316_v9 = vmul.f32 -1.442695, %v3405_v12 }
 0x47e   :  { %v2317_v27 = vmul.f32 -1.442695, %v3406_v21 }
 0x47f   :  { %3475 = vpow2.f32 %v2316_v9 }
 0x480   :  { %3477 = vpow2.f32 %v2317_v27 }
 0x489   :  { %v3476_v32 = vpop.eup %3475 }
 0x48a   :  { %v1280_v36 = vadd.f32 1.0, %v3476_v32  ;;  %v3478_v38 = vpop.eup %3477 }
 0x48b   :  { %v1287_v39 = vadd.f32 1.0, %v3478_v38 }
 0x48c   :  { %3479 = vrcp.f32 %v1280_v36 }
 0x48d   :  { %3481 = vrcp.f32 %v1287_v39 }
 0x496   :  { %v3480_v25 = vpop.eup %3479 }
 0x497   :  { %v1291_v34 = vmul.f32 %v3480_v25, %v1290_v17  ;;  %v3482_v45 = vpop.eup %3481 }
 0x498   :  { %v1294_v55 = vsub.f32 1.0, %v3482_v45  ;;  %v1296_v13 = vmul.f32 %v3482_v45, %v4069_v43  ;;  %v1530_v43 = vld [vmem:[#allocation10 + $0x28] sm:$0xff] }
 0x499   :  { %v1292_v35 = vadd.f32 %v1291_v34, %v3967_v49  ;;  %v1527_v49 = vld [vmem:[#allocation10 + $0x10] sm:$0xff] }
 0x49a   :  { %v4179_v20 = vpack.c.bf16 %v1530_v43, %v1527_v49 }
 0x49b   :  { %3483 = vtanh.f32 %v1292_v35 }
 0x4a5   :  { %v3484_v56 = vpop.eup %3483 }
 0x4a6   :  { %v1295_v2 = vmul.f32 %v3484_v56, %v1294_v55 }
 0x4a8   :  { %v4156_v15 = vadd.f32 %v1296_v13, %v1295_v2 }
 0x4aa   :  { %1419 = vmatmul.mubr.f32.vlgmr.msra.gmra.mrb[8].mxu0 %v4156_v15  ;;  %2721 = vmatmul.mubr.f32.vlgmr.msra.gmra.mrb[16].mxu1 %v4156_v15 }
 0x4ab   :  { %3210 = vmatpush1.bf16.msra.mxu0 %v4084_v57  ;;  %1637 = vmatprep.mubr.f32.mxu0 %v3699_v0 }
 0x4ac   :  { %3212 = vmatprep.subr.bf16.mxu0 %v4088_v62  ;;  %2755 = vmatprep.mubr.msk.f32.mxu1 %vm3701_vm0, %v3699_v0 }
 0x4ad   :  { %3241 = vmatpush3.bf16.msra.mxu1 %v4179_v20 }
 0x4ae   :  { %3242 = vmatprep.subr.bf16.mxu1 %v3700_v40 }
 0x4af   :  { %3214 = vmatpush1.bf16.msra.mxu0 %v4090_v42 }
 0x4b0   :  { %3216 = vmatprep.subr.bf16.mxu0 %v4094_v3 }
 0x4b1   :  { %3244 = vmatpush3.bf16.msra.mxu1 %v4183_v33 }
 0x4b2   :  { %3245 = vmatprep.subr.bf16.mxu1 %v3700_v40 }
 0x4b3   :  { %3218 = vmatpush1.bf16.msra.mxu0 %v4096_v11 }
 0x4b4   :  { %3220 = vmatprep.subr.bf16.mxu0 %v4100_v16 }
 0x4b5   :  { %3247 = vmatpush3.bf16.msra.mxu1 %v4187_v59 }
 0x4b6   :  { %3248 = vmatprep.subr.bf16.mxu1 %v3700_v40 }
 0x4b7   :  { %3222 = vmatpush1.bf16.msra.mxu0 %v4102_v22 }
 0x4b8   :  { %3224 = vmatprep.subr.bf16.mxu0 %v4109_v37 }
 0x4b9   :  { %3250 = vmatpush3.bf16.msra.mxu1 %v4105_v28 }
 0x4ba   :  { %3251 = vmatprep.subr.bf16.mxu1 %v3700_v40 }
 0x4bb   :  { %3226 = vmatpush1.bf16.msra.mxu0 %v4112_v18 }
 0x4bc   :  { %3228 = vmatprep.subr.bf16.mxu0 %v4119_v46 }
 0x4bd   :  { %3253 = vmatpush3.bf16.msra.mxu1 %v4115_v26 }
 0x4be   :  { %3254 = vmatprep.subr.bf16.mxu1 %v3700_v40 }
 0x4bf   :  { %3230 = vmatpush1.bf16.msra.mxu0 %v4122_v4 }
 0x4c0   :  { %3232 = vmatprep.subr.bf16.mxu0 %v4127_v23 }
 0x4c1   :  { %3256 = vmatpush3.bf16.msra.mxu1 %v4124_v10 }
 0x4c2   :  { %3257 = vmatprep.subr.bf16.mxu1 %v3700_v40 }
 0x4c3   :  { %3234 = vmatpush1.bf16.msra.mxu0 %v4130_v44 }
 0x4c4   :  { %3236 = vmatprep.subr.bf16.mxu0 %v4136_v53 }
 0x4c5   :  { %3259 = vmatpush3.bf16.msra.mxu1 %v4134_v41 }
 0x4c6   :  { %3260 = vmatprep.subr.bf16.mxu1 %v3700_v40 }
 0x4c7   :  { %3238 = vmatpush1.bf16.msra.mxu0 %v4140_v47 }
 0x4c8   :  { %3264 = vmatprep.subr.bf16.mxu0 %v4082_v50 }
 0x4c9   :  { %3262 = vmatpush3.bf16.msra.mxu1 %v4144_v1 }
 0x4ca   :  { %3295 = vmatprep.subr.bf16.mxu1 %v3700_v40 }
 0x57d   :  { %v1420_v51 = vpop.f32.mrb[8].mxu0  ;;  %v1491_v29 = vpop.f32.mrb[16].mxu1 }
 0x57e   :  { %v3407_v61 = vadd.f32 %v1420_v51, %v3979_v5  ;;  %v1422_v6 = vpop.f32.mrb[9].mxu0  ;;  %v2722_v8 = vpop.f32.mrb[17].mxu1  ;;  %v1509_v36 = vadd.f32 %v3988_v31, %v1491_v29 }
 0x57f   :  { %v3408_v14 = vadd.f32 %v1422_v6, %v3981_v7 }
 0x580   :  { %v2318_v12 = vmul.f32 -1.442695, %v3407_v61 }
 0x581   :  { %v2319_v19 = vmul.f32 -1.442695, %v3408_v14 }
 0x582   :  { %3485 = vpow2.f32 %v2318_v12 }
 0x583   :  { %3487 = vpow2.f32 %v2319_v19 }
 0x58c   :  { %v3486_v9 = vpop.eup %3485 }
 0x58d   :  { %v1499_v21 = vadd.f32 1.0, %v3486_v9  ;;  %v3488_v27 = vpop.eup %3487 }
 0x58e   :  { %v1506_v32 = vadd.f32 1.0, %v3488_v27 }
 0x58f   :  { %3489 = vrcp.f32 %v1499_v21 }
 0x590   :  { %3491 = vrcp.f32 %v1506_v32  ;;  %v2180_v32 = vld [vmem:[#allocation12 + $0x18] sm:$0xff] }
 0x599   :  { %v3490_v38 = vpop.eup %3489 }
 0x59a   :  { %v1510_v39 = vmul.f32 %v3490_v38, %v1509_v36  ;;  %v3492_v25 = vpop.eup %3491  ;;  %v2181_v38 = vld [vmem:[#allocation12 + $0x20] sm:$0xff] }
 0x59b   :  { %v1513_v34 = vsub.f32 1.0, %v3492_v25  ;;  %v1515_v55 = vmul.f32 %v3492_v25, %v4156_v15  ;;  %v2183_v25 = vld [vmem:[#allocation12 + $0x30] sm:$0xff] }
 0x59c   :  { %v1511_v17 = vadd.f32 %v1510_v39, %v3973_v58  ;;  %v2182_v39 = vld [vmem:[#allocation12 + $0x28] sm:$0xff] }
 0x59e   :  { %3493 = vtanh.f32 %v1511_v17  ;;  %v3382_v17 = vpack.c.bf16 %v2182_v39, %v2181_v38 }
 0x5a8   :  { %v3494_v35 = vpop.eup %3493 }
 0x5a9   :  { %v1514_v45 = vmul.f32 %v3494_v35, %v1513_v34  ;;  %v2185_v35 = vld [vmem:[#allocation12 + $0x40] sm:$0xff] }
 0x5ab   :  { %v1516_v56 = vadd.f32 %v1515_v55, %v1514_v45  ;;  %v2186_v45 = vld [vmem:[#allocation12 + $0x48] sm:$0xff] }
 0x5ac   :  { %v3388_v55 = vpack.c.bf16 %v2186_v45, %v2185_v35 }
 0x5ad   :  { %1638 = vmatmul.mubr.f32.vlgmr.msra.gmra.mrb[10].mxu0 %v1516_v56  ;;  %2756 = vmatmul.mubr.f32.vlgmr.msra.gmra.mrb[18].mxu1 %v1516_v56 }
 0x5ae   :  { %3266 = vmatpush1.bf16.msra.mxu0 %v4084_v57  ;;  %3297 = vmatpush3.bf16.msra.mxu1 %v4179_v20 }
 0x5af   :  { %3268 = vmatprep.subr.bf16.mxu0 %v4088_v62  ;;  %3298 = vmatprep.subr.bf16.mxu1 %v3700_v40 }
 0x5b0   :  { %1856 = vmatprep.mubr.f32.mxu0 %v3699_v0  ;;  %2790 = vmatprep.mubr.msk.f32.mxu1 %vm3701_vm0, %v3699_v0 }
 0x5b2   :  { %3270 = vmatpush1.bf16.msra.mxu0 %v4090_v42  ;;  %3300 = vmatpush3.bf16.msra.mxu1 %v4183_v33 }
 0x5b3   :  { %3272 = vmatprep.subr.bf16.mxu0 %v4094_v3  ;;  %3301 = vmatprep.subr.bf16.mxu1 %v3700_v40 }
 0x5b6   :  { %3274 = vmatpush1.bf16.msra.mxu0 %v4096_v11  ;;  %3303 = vmatpush3.bf16.msra.mxu1 %v4187_v59 }
 0x5b7   :  { %3276 = vmatprep.subr.bf16.mxu0 %v4100_v16  ;;  %3304 = vmatprep.subr.bf16.mxu1 %v3700_v40 }
 0x5ba   :  { %3278 = vmatpush1.bf16.msra.mxu0 %v4102_v22  ;;  %3306 = vmatpush3.bf16.msra.mxu1 %v4105_v28 }
 0x5bb   :  { %3280 = vmatprep.subr.bf16.mxu0 %v4109_v37  ;;  %3307 = vmatprep.subr.bf16.mxu1 %v3700_v40 }
 0x5be   :  { %3282 = vmatpush1.bf16.msra.mxu0 %v4112_v18  ;;  %3309 = vmatpush3.bf16.msra.mxu1 %v4115_v26 }
 0x5bf   :  { %3284 = vmatprep.subr.bf16.mxu0 %v4119_v46  ;;  %3310 = vmatprep.subr.bf16.mxu1 %v3700_v40 }
 0x5c2   :  { %3286 = vmatpush1.bf16.msra.mxu0 %v4122_v4  ;;  %3312 = vmatpush3.bf16.msra.mxu1 %v4124_v10 }
 0x5c3   :  { %3288 = vmatprep.subr.bf16.mxu0 %v4127_v23  ;;  %3313 = vmatprep.subr.bf16.mxu1 %v3700_v40 }
 0x5c6   :  { %3290 = vmatpush1.bf16.msra.mxu0 %v4130_v44  ;;  %3315 = vmatpush3.bf16.msra.mxu1 %v4134_v41 }
 0x5c7   :  { %3292 = vmatprep.subr.bf16.mxu0 %v4136_v53  ;;  %3316 = vmatprep.subr.bf16.mxu1 %v3700_v40 }
 0x5ca   :  { %3294 = vmatpush1.bf16.msra.mxu0 %v4140_v47  ;;  %3318 = vmatpush3.bf16.msra.mxu1 %v4144_v1 }
 0x5cb   :  { %3320 = vmatprep.subr.bf16.mxu0 %v4082_v50  ;;  %3351 = vmatprep.subr.bf16.mxu1 %v3700_v40 }
 0x680   :  { %v1639_v58 = vpop.f32.mrb[10].mxu0  ;;  %v1710_v2 = vpop.f32.mrb[18].mxu1 }
 0x681   :  { %v3409_v13 = vadd.f32 %v1639_v58, %v3979_v5  ;;  %v1641_v15 = vpop.f32.mrb[11].mxu0  ;;  %v2757_v49 = vpop.f32.mrb[19].mxu1  ;;  %v1728_v50 = vadd.f32 %v3988_v31, %v1710_v2  ;;  %v2188_v58 = vld [vmem:[#allocation12 + $0x58] sm:$0xff] }
 0x682   :  { %v3410_v24 = vadd.f32 %v1641_v15, %v3981_v7  ;;  %v2190_v15 = vld [vmem:[#allocation12 + $0x68] sm:$0xff] }
 0x683   :  { %v2320_v43 = vmul.f32 -1.442695, %v3409_v13  ;;  %v2189_v13 = vld [vmem:[#allocation12 + $0x60] sm:$0xff] }
 0x684   :  { %v2321_v30 = vmul.f32 -1.442695, %v3410_v24  ;;  %v3394_v49 = vpack.c.bf16 %v2190_v15, %v2189_v13  ;;  %v2192_v24 = vld [vmem:[#allocation12 + $0x78] sm:$0xff] }
 0x685   :  { %3495 = vpow2.f32 %v2320_v43  ;;  %v2191_v43 = vld [vmem:[#allocation12 + $0x70] sm:$0xff] }
 0x686   :  { %3497 = vpow2.f32 %v2321_v30  ;;  %v3397_v30 = vpack.c.bf16 %v2192_v24, %v2191_v43 }
 0x68f   :  { %v3496_v52 = vpop.eup %3495 }
 0x690   :  { %v1718_v48 = vadd.f32 1.0, %v3496_v52  ;;  %v3498_v51 = vpop.eup %3497 }
 0x691   :  { %v1725_v29 = vadd.f32 1.0, %v3498_v51 }
 0x692   :  { %3499 = vrcp.f32 %v1718_v48 }
 0x693   :  { %3501 = vrcp.f32 %v1725_v29 }
 0x69c   :  { %v3500_v61 = vpop.eup %3499 }
 0x69d   :  { %v1729_v6 = vmul.f32 %v3500_v61, %v1728_v50  ;;  %v3502_v12 = vpop.eup %3501 }
 0x69e   :  { %v1732_v14 = vsub.f32 1.0, %v3502_v12  ;;  %v1734_v21 = vmul.f32 %v3502_v12, %v1516_v56  ;;  %v2187_v56 = vld [vmem:[#allocation12 + $0x50] sm:$0xff] }
 0x69f   :  { %v1730_v8 = vadd.f32 %v1729_v6, %v3971_v54  ;;  %v3391_v2 = vpack.c.bf16 %v2188_v58, %v2187_v56 }
 0x6a1   :  { %3503 = vtanh.f32 %v1730_v8 }
 0x6ab   :  { %v3504_v19 = vpop.eup %3503 }
 0x6ac   :  { %v1733_v9 = vmul.f32 %v3504_v19, %v1732_v14 }
 0x6ae   :  { %v1735_v27 = vadd.f32 %v1734_v21, %v1733_v9 }
 0x6b0   :  { %1857 = vmatmul.mubr.f32.vlgmr.msra.gmra.mrb[12].mxu0 %v1735_v27  ;;  %2791 = vmatmul.mubr.f32.vlgmr.msra.gmra.mrb[20].mxu1 %v1735_v27 }
 0x6b1   :  { %3322 = vmatpush1.bf16.msra.mxu0 %v4084_v57  ;;  %3353 = vmatpush3.bf16.msra.mxu1 %v4179_v20 }
 0x6b2   :  { %3324 = vmatprep.subr.bf16.mxu0 %v4088_v62  ;;  %3354 = vmatprep.subr.bf16.mxu1 %v3700_v40 }
 0x6b3   :  { %2075 = vmatprep.mubr.f32.mxu0 %v3699_v0  ;;  %2825 = vmatprep.mubr.msk.f32.mxu1 %vm3701_vm0, %v3699_v0 }
 0x6b5   :  { %3326 = vmatpush1.bf16.msra.mxu0 %v4090_v42  ;;  %3356 = vmatpush3.bf16.msra.mxu1 %v4183_v33  ;;  %v2178_v33 = vld [vmem:[#allocation12 + $0x8] sm:$0xff] }
 0x6b6   :  { %3328 = vmatprep.subr.bf16.mxu0 %v4094_v3  ;;  %3357 = vmatprep.subr.bf16.mxu1 %v3700_v40 }
 0x6b9   :  { %3330 = vmatpush1.bf16.msra.mxu0 %v4096_v11  ;;  %3359 = vmatpush3.bf16.msra.mxu1 %v4187_v59 }
 0x6ba   :  { %3332 = vmatprep.subr.bf16.mxu0 %v4100_v16  ;;  %3360 = vmatprep.subr.bf16.mxu1 %v3700_v40 }
 0x6bd   :  { %3334 = vmatpush1.bf16.msra.mxu0 %v4102_v22  ;;  %3362 = vmatpush3.bf16.msra.mxu1 %v4105_v28 }
 0x6be   :  { %3336 = vmatprep.subr.bf16.mxu0 %v4109_v37  ;;  %3363 = vmatprep.subr.bf16.mxu1 %v3700_v40 }
 0x6c1   :  { %3338 = vmatpush1.bf16.msra.mxu0 %v4112_v18  ;;  %3365 = vmatpush3.bf16.msra.mxu1 %v4115_v26 }
 0x6c2   :  { %3340 = vmatprep.subr.bf16.mxu0 %v4119_v46  ;;  %3366 = vmatprep.subr.bf16.mxu1 %v3700_v40 }
 0x6c5   :  { %3342 = vmatpush1.bf16.msra.mxu0 %v4122_v4  ;;  %3368 = vmatpush3.bf16.msra.mxu1 %v4124_v10 }
 0x6c6   :  { %3344 = vmatprep.subr.bf16.mxu0 %v4127_v23  ;;  %3369 = vmatprep.subr.bf16.mxu1 %v3700_v40 }
 0x6c9   :  { %3346 = vmatpush1.bf16.msra.mxu0 %v4130_v44  ;;  %3371 = vmatpush3.bf16.msra.mxu1 %v4134_v41 }
 0x6ca   :  { %3348 = vmatprep.subr.bf16.mxu0 %v4136_v53  ;;  %3372 = vmatprep.subr.bf16.mxu1 %v3700_v40 }
 0x6cd   :  { %3350 = vmatpush1.bf16.msra.mxu0 %v4140_v47  ;;  %3374 = vmatpush3.bf16.msra.mxu1 %v4144_v1 }
 0x6ce   :  { %3375 = vmatprep.subr.bf16.mxu0 %v3700_v40 }
 0x783   :  { %v1858_v54 = vpop.f32.mrb[12].mxu0  ;;  %v1929_v57 = vpop.f32.mrb[20].mxu1 }
 0x784   :  { %v3411_v62 = vadd.f32 %v1858_v54, %v3979_v5  ;;  %v1860_v42 = vpop.f32.mrb[13].mxu0  ;;  %v2792_v3 = vpop.f32.mrb[21].mxu1  ;;  %v1947_v46 = vadd.f32 %v3988_v31, %v1929_v57  ;;  %v2177_v31 = vld [vmem:[#allocation12] sm:$0xff] }
 0x785   :  { %v3412_v16 = vadd.f32 %v1860_v42, %v3981_v7  ;;  %v3376_v59 = vpack.c.bf16 %v2178_v33, %v2177_v31 }
 0x786   :  { %v2322_v11 = vmul.f32 -1.442695, %v3411_v62 }
 0x787   :  { %v2323_v22 = vmul.f32 -1.442695, %v3412_v16 }
 0x788   :  { %3505 = vpow2.f32 %v2322_v11 }
 0x789   :  { %3507 = vpow2.f32 %v2323_v22 }
 0x792   :  { %v3506_v28 = vpop.eup %3505 }
 0x793   :  { %v1937_v37 = vadd.f32 1.0, %v3506_v28  ;;  %v3508_v18 = vpop.eup %3507 }
 0x794   :  { %v1944_v26 = vadd.f32 1.0, %v3508_v18 }
 0x795   :  { %3509 = vrcp.f32 %v1937_v37 }
 0x796   :  { %3511 = vrcp.f32 %v1944_v26 }
 0x79f   :  { %v3510_v4 = vpop.eup %3509 }
 0x7a0   :  { %v1948_v10 = vmul.f32 %v3510_v4, %v1947_v46  ;;  %v3512_v44 = vpop.eup %3511 }
 0x7a1   :  { %v1951_v41 = vsub.f32 1.0, %v3512_v44  ;;  %v1953_v1 = vmul.f32 %v3512_v44, %v1735_v27 }
 0x7a2   :  { %v1949_v23 = vadd.f32 %v1948_v10, %v3977_v63  ;;  %v2179_v63 = vld [vmem:[#allocation12 + $0x10] sm:$0xff] }
 0x7a3   :  { %v3379_v36 = vpack.c.bf16 %v2180_v32, %v2179_v63 }
 0x7a4   :  { %3513 = vtanh.f32 %v1949_v23 }
 0x7ae   :  { %v3514_v53 = vpop.eup %3513 }
 0x7af   :  { %v1952_v47 = vmul.f32 %v3514_v53, %v1951_v41 }
 0x7b1   :  { %v4283_v20 = vadd.f32 %v1953_v1, %v1952_v47 }
 0x7b3   :  { %2076 = vmatmul.mubr.f32.vlgmr.msra.gmra.mrb[14].mxu0 %v4283_v20  ;;  %2826 = vmatmul.mubr.f32.vlgmr.msra.gmra.mrb[22].mxu1 %v4283_v20 }
 0x7b4   :  { %2860 = vmatprep.mubr.msk.f32.mxu0 %vm3701_vm0, %v3699_v0  ;;  %3377 = vmatpush3.bf16.msra.mxu0 %v3376_v59  ;;  %v2184_v0 = vld [vmem:[#allocation12 + $0x38] sm:$0xff] }
 0x7b5   :  { %3378 = vmatprep.subr.bf16.mxu0 %v3700_v40  ;;  %v3385_v34 = vpack.c.bf16 %v2184_v0, %v2183_v25 }
 0x7b8   :  { %3380 = vmatpush3.bf16.msra.mxu0 %v3379_v36 }
 0x7b9   :  { %3381 = vmatprep.subr.bf16.mxu0 %v3700_v40 }
 0x7bc   :  { %3383 = vmatpush3.bf16.msra.mxu0 %v3382_v17 }
 0x7bd   :  { %3384 = vmatprep.subr.bf16.mxu0 %v3700_v40 }
 0x7c0   :  { %3386 = vmatpush3.bf16.msra.mxu0 %v3385_v34 }
 0x7c1   :  { %3387 = vmatprep.subr.bf16.mxu0 %v3700_v40 }
 0x7c4   :  { %3389 = vmatpush3.bf16.msra.mxu0 %v3388_v55 }
 0x7c5   :  { %3390 = vmatprep.subr.bf16.mxu0 %v3700_v40 }
 0x7c8   :  { %3392 = vmatpush3.bf16.msra.mxu0 %v3391_v2 }
 0x7c9   :  { %3393 = vmatprep.subr.bf16.mxu0 %v3700_v40 }
 0x7cc   :  { %3395 = vmatpush3.bf16.msra.mxu0 %v3394_v49 }
 0x7cd   :  { %3396 = vmatprep.subr.bf16.mxu0 %v3700_v40  ;;  %v3525_v40 = vld [vmem:[%s4335_s5] ss:$0 sm:$0xff]  ;;  %s3636_s5 = scalar_lea.vmem %s2288_s11, 128 }
 0x7ce   :  { %p3637_p12 = scmp.ne.s32.totalorder %s2288_s11, %s3636_s5  ;;  %p3642_p0 = scmp.lt.s32.totalorder %s3636_s5, %s3636_s5 }
 0x7d0   :  { %3398 = vmatpush3.bf16.msra.mxu0 %v3397_v30  ;;  %p3643_p1 = por %p3642_p0, %p3641_p13 }
 0x7d2   :  { %p3644_p2 = pnand %p3643_p1, %p3637_p12 }
 0x886   :  { %v2077_v52 = vpop.f32.mrb[14].mxu0  ;;  %v2148_v48 = vpop.f32.mrb[22].mxu1 }
 0x887   :  { %v3413_v51 = vadd.f32 %v2077_v52, %v3979_v5  ;;  %v2079_v29 = vpop.f32.mrb[15].mxu0  ;;  %v2827_v50 = vpop.f32.mrb[23].mxu1  ;;  %v2166_v21 = vadd.f32 %v3525_v40, %v2148_v48 }
 0x888   :  { %v3414_v6 = vadd.f32 %v2079_v29, %v3981_v7 }
 0x889   :  { %v2324_v61 = vmul.f32 -1.442695, %v3413_v51 }
 0x88a   :  { %v2325_v8 = vmul.f32 -1.442695, %v3414_v6 }
 0x88b   :  { %3515 = vpow2.f32 %v2324_v61 }
 0x88c   :  { %3517 = vpow2.f32 %v2325_v8 }
 0x895   :  { %v3516_v12 = vpop.eup %3515 }
 0x896   :  { %v2156_v14 = vadd.f32 1.0, %v3516_v12  ;;  %v3518_v19 = vpop.eup %3517 }
 0x897   :  { %v2163_v9 = vadd.f32 1.0, %v3518_v19 }
 0x898   :  { %3519 = vrcp.f32 %v2156_v14 }
 0x899   :  { %3521 = vrcp.f32 %v2163_v9 }
 0x8a2   :  { %v3520_v27 = vpop.eup %3519 }
 0x8a3   :  { %v2167_v5 = vmul.f32 %v3520_v27, %v2166_v21  ;;  %v3522_v7 = vpop.eup %3521 }
 0x8a4   :  { %v2170_v57 = vsub.f32 1.0, %v3522_v7  ;;  %v2172_v3 = vmul.f32 %v3522_v7, %v4283_v20 }
 0x8a5   :  { %v2168_v54 = vadd.f32 %v2167_v5, %v3975_v60 }
 0x8a7   :  { %3523 = vtanh.f32 %v2168_v54 }
 0x8b1   :  { %v3524_v62 = vpop.eup %3523 }
 0x8b2   :  { %v2171_v42 = vmul.f32 %v3524_v62, %v2170_v57 }
 0x8b4   :  { %v2173_v11 = vadd.f32 %v2172_v3, %v2171_v42 }
 0x8b6   :  { %2861 = vmatmul.mubr.f32.vlgmr.msra.gmra.mrb[16].mxu0 %v2173_v11  ;;  %2176 = vst [vmem:[#allocation14] sm:$0xff] %v2173_v11 }
 0x8b7   :  { %3647 = shalt.err (!%p3644_p2)
}
 0x8b8   :  { %s3648_s14 = scalar_lea.hbm %s4339_s9, 128 }
 0x8b9   :  { %p3649_p3 = scmp.ne.s32.totalorder %s4339_s9, %s3648_s14  ;;  %p3652_p4 = scmp.lt.u32.totalorder %s3648_s14, %s4339_s9 }
 0x8bb   :  { %p3654_p5 = pnand %p3652_p4, %p3649_p3 }
 0x8bd   :  { %3657 = shalt.err (!%p3654_p5)
}
 0x8be   :  { %2290 = dma.vmem_to_hbm [thread:$0]  %s2288_s11, 128, %s4339_s9, [#allocation15]   ;;  %v2326_v60 = vld [vmem:[%s4337_s7] ss:$0 sm:$0xff] }
 0x8bf   :  { %s3703_s21 = smov [#allocation13]  }
 0x8c0   :  { %s2277_s23 = sshll.u32 %s3703_s21, 4  ;;  %s2278_s23 = int_to_ptr.vmem [resolvable:$true] %s2277_s23 }
 0x8c1   :  { %s3658_s25 = scalar_lea.vmem %s2278_s23, 128  ;;  %p3663_p7 = scmp.lt.s32.totalorder %s2278_s23, %s2278_s23 }
 0x8c2   :  { %p3659_p6 = scmp.ne.s32.totalorder %s2278_s23, %s3658_s25  ;;  %p3664_p8 = scmp.lt.s32.totalorder %s3658_s25, %s3658_s25 }
 0x8c4   :  { %p3665_p9 = por %p3664_p8, %p3663_p7 }
 0x8c6   :  { %p3666_p10 = pnand %p3665_p9, %p3659_p6 }
 0x989   :  { %v2266_v16 = vpop.f32.mrb[16].mxu0 }
 0x98a   :  { %v2267_v22 = vadd.f32 %v2326_v60, %v2266_v16  ;;  %v2862_v28 = vpop.f32.mrb[17].mxu0 }
 0x98c   :  { %2270 = vst [vmem:[#allocation13] sm:$0xff] %v2267_v22 }
 0x98d   :  { %3669 = shalt.err (!%p3666_p10)
}
 0x98e   :  { %s3670_s27 = scalar_lea.hbm %s4338_s8, 128 }
 0x98f   :  { %p3671_p11 = scmp.ne.s32.totalorder %s4338_s8, %s3670_s27  ;;  %p3674_p12 = scmp.lt.u32.totalorder %s3670_s27, %s4338_s8 }
 0x991   :  { %p3676_p13 = pnand %p3674_p12, %p3671_p11 }
 0x993   :  { %3679 = shalt.err (!%p3676_p13)
}
 0x994   :  { %2280 = dma.vmem_to_hbm [thread:$0]  %s2278_s23, 128, %s4338_s8, [#allocation6]  }
 0x995   :  { %3686 = dma.done.wait [#allocation6], 128  }
 0x996   :  { %3687 = vsyncadd [#allocation6], 4294967168 }
 0x997   :  { %3688 = dma.done.wait [#allocation15], 128  }
 0x998   :  { %3689 = vsyncadd [#allocation15], 4294967168 }
 0x999   :  { %2297 = vsyncpa [#allocation5], 1 }
 0x99a   :  { %2298 = vsyncpa [#allocation8], 1 }
 0x99b   :  { %2299 = vsyncpa [#allocation11], 1 }
 0x99c   :  { %2300 = vsyncpa [#allocation6], 1 }
 0x99d   :  { %2301 = vsyncpa [#allocation15], 1 }

</bundles_post_ra>
